<compile_context>
chip_gen: v5e
topology: v5e:2x2
jax: 0.10.0
libtpu: 0.0.40
codegen_flags: <defaults>
</compile_context>

<pallas_src>
import functools

import jax
import jax.numpy as jnp
from jax import lax
from jax.experimental import pallas as pl
from jax.experimental.pallas import tpu as pltpu


def _nce_vs_vc_kernel(temp_ref, vis_ref, txtT_ref, capT_ref, out_ref,
                      m1_ref, l1_ref, m2_ref, l2_ref,
                      cmax1_ref, csum1_ref, cmax2_ref, csum2_ref,
                      acc_ref, *, n_rows, tm, tn):
    i = pl.program_id(0)
    j = pl.program_id(1)
    n_i = pl.num_programs(0)
    n_j = pl.num_programs(1)

    # ---- one-time init of the cross-grid accumulators -----------------------
    @pl.when(jnp.logical_and(i == 0, j == 0))
    def _init_global():
        acc_ref[...] = jnp.zeros_like(acc_ref)
        cmax1_ref[...] = jnp.full_like(cmax1_ref, -jnp.inf)
        csum1_ref[...] = jnp.zeros_like(csum1_ref)
        cmax2_ref[...] = jnp.full_like(cmax2_ref, -jnp.inf)
        csum2_ref[...] = jnp.zeros_like(csum2_ref)

    # ---- per-row-stripe init (row-online logsumexp state) -------------------
    @pl.when(j == 0)
    def _init_rows():
        m1_ref[...] = jnp.full_like(m1_ref, -jnp.inf)
        l1_ref[...] = jnp.zeros_like(l1_ref)
        m2_ref[...] = jnp.full_like(m2_ref, -jnp.inf)
        l2_ref[...] = jnp.zeros_like(l2_ref)

    # exp(temp): a single scalar transcendental per step; applied to the f32
    # logits post-dot so bf16 inputs keep exact (reference-matching) scaling.
    scale = jnp.exp(temp_ref[0, 0])

    # Global tile offsets; the tile touches the global diagonal iff the row
    # and column index ranges overlap (works for rectangular tiles).
    row0 = i * tm
    col0 = j * tn
    has_diag = jnp.logical_and(row0 < col0 + tn, col0 < row0 + tm)

    def _process(rhsT_ref, m_ref, l_ref, cmax_ref, csum_ref):
        # TODO(synk): on v5e, cast f32 inputs to bf16 before the dot (keep
        # preferred_element_type=f32) to avoid the multi-pass f32 MXU path.
        logits = jnp.dot(vis_ref[...], rhsT_ref[...],
                         preferred_element_type=jnp.float32) * scale

        # ---- diagonal contribution (global-offset test) ----------------------
        @pl.when(has_diag)
        def _diag():
            rows = lax.broadcasted_iota(jnp.int32, (tm, tn), 0) + row0
            cols = lax.broadcasted_iota(jnp.int32, (tm, tn), 1) + col0
            dsum = jnp.sum(jnp.where(rows == cols, logits, 0.0))
            acc_ref[...] = acc_ref[...] - 2.0 * dsum

        # ---- row-wise online logsumexp (t2v direction) -----------------------
        m_prev = m_ref[...]
        m_new = jnp.maximum(m_prev, jnp.max(logits, axis=1, keepdims=True))
        p = jnp.exp(logits - m_new)
        l_ref[...] = (l_ref[...] * jnp.exp(m_prev - m_new)
                      + jnp.sum(p, axis=1, keepdims=True))
        m_ref[...] = m_new

        # ---- column-wise online logsumexp (v2t direction) --------------------
        # TODO(synk): if features are L2-normalized and temp is clamped
        # (bounded logit range), derive the column sums from p via the rank-1
        # correction sum_i p[i,:]*exp(m_new[i]-c_new[:]) and halve the EUP
        # (exp) work; kept as a separate column-shifted exp for overflow
        # safety with unbounded logits.
        c_prev = cmax_ref[j]                                    # (1, tn)
        c_new = jnp.maximum(c_prev, jnp.max(logits, axis=0, keepdims=True))
        q = jnp.exp(logits - c_new)
        csum_ref[j] = (csum_ref[j] * jnp.exp(c_prev - c_new)
                       + jnp.sum(q, axis=0, keepdims=True))
        cmax_ref[j] = c_new

    # Process the two logit matrices sequentially (perf review: only one
    # (tm, tn) f32 tile chain live at a time).
    _process(txtT_ref, m1_ref, l1_ref, cmax1_ref, csum1_ref)
    _process(capT_ref, m2_ref, l2_ref, cmax2_ref, csum2_ref)

    # ---- finalize the row logsumexp for this row stripe ----------------------
    @pl.when(j == n_j - 1)
    def _finalize_rows():
        row_lse = (jnp.sum(m1_ref[...] + jnp.log(l1_ref[...]))
                   + jnp.sum(m2_ref[...] + jnp.log(l2_ref[...])))
        acc_ref[...] = acc_ref[...] + row_lse

    # ---- final reduction to the scalar loss -----------------------------------
    @pl.when(jnp.logical_and(i == n_i - 1, j == n_j - 1))
    def _finalize():
        col_lse = (jnp.sum(cmax1_ref[...] + jnp.log(csum1_ref[...]))
                   + jnp.sum(cmax2_ref[...] + jnp.log(csum2_ref[...])))
        out_ref[...] = (acc_ref[...] + col_lse) * (1.0 / float(n_rows))


def nce_learnable_temp_loss_vs_vc(vis_feat, text_feat, img_feat, cap_feat, temp,
                                  *, block_m=512, block_n=256):
    """Pallas implementation of NCELearnableTempLoss_vs_vc.forward.

    img_feat is accepted for signature parity but is unused by the reference
    module's forward pass.

    block_m >> block_n is preferred: txt^T/cap^T are re-streamed once per row
    stripe, so streamed HBM bytes scale as 2*(N/block_m)*N*D.
    """
    del img_feat  # unused by the original PyTorch forward
    n, d = vis_feat.shape
    assert text_feat.shape == (n, d) and cap_feat.shape == (n, d)

    tm = min(block_m, n)
    tn = min(block_n, n)
    # TODO(synk): mask padded rows/cols (-inf pre-softmax, exclude from the
    # diagonal and the /N mean) to support N not divisible by the tile sizes.
    assert n % tm == 0 and n % tn == 0, "N must be divisible by the tile sizes"

    n_i = n // tm
    n_j = n // tn

    # Layout plumbing: present text/cap as (D, N) so the kernel runs plain
    # NN matmuls (no per-tile RHS transpose on the XLU).
    txt_t = jnp.transpose(text_feat, (1, 0))
    cap_t = jnp.transpose(cap_feat, (1, 0))
    temp2d = jnp.reshape(temp, (1, 1)).astype(jnp.float32)

    kernel = functools.partial(_nce_vs_vc_kernel, n_rows=n, tm=tm, tn=tn)

    itemsize = jnp.dtype(vis_feat.dtype).itemsize
    cost = pl.CostEstimate(
        flops=4 * n * n * d,                 # two N*N*D matmuls
        transcendentals=4 * n * n,           # row- and col-shifted exp, 2 mats
        bytes_accessed=(n * d + 2 * n_i * n * d) * itemsize + 4)

    grid_spec = pltpu.PrefetchScalarGridSpec(
        num_scalar_prefetch=0,
        grid=(n_i, n_j),
        in_specs=[
            pl.BlockSpec(memory_space=pltpu.MemorySpace.SMEM),  # temp (1, 1)
            pl.BlockSpec((tm, d), lambda i, j: (i, 0)),         # vis row tile
            pl.BlockSpec((d, tn), lambda i, j: (0, j)),         # text^T col tile
            pl.BlockSpec((d, tn), lambda i, j: (0, j)),         # cap^T col tile
        ],
        out_specs=pl.BlockSpec((1, 1), lambda i, j: (0, 0)),
        scratch_shapes=[
            pltpu.VMEM((tm, 1), jnp.float32),       # m1: row running max (vis-text)
            pltpu.VMEM((tm, 1), jnp.float32),       # l1: row running sum (vis-text)
            pltpu.VMEM((tm, 1), jnp.float32),       # m2: row running max (vis-cap)
            pltpu.VMEM((tm, 1), jnp.float32),       # l2: row running sum (vis-cap)
            pltpu.VMEM((n_j, 1, tn), jnp.float32),  # col running max (vis-text)
            pltpu.VMEM((n_j, 1, tn), jnp.float32),  # col running sum (vis-text)
            pltpu.VMEM((n_j, 1, tn), jnp.float32),  # col running max (vis-cap)
            pltpu.VMEM((n_j, 1, tn), jnp.float32),  # col running sum (vis-cap)
            pltpu.VMEM((1, 1), jnp.float32),        # scalar loss accumulator
        ],
    )

    out = pl.pallas_call(
        kernel,
        out_shape=jax.ShapeDtypeStruct((1, 1), jnp.float32),
        grid_spec=grid_spec,
        cost_estimate=cost,
        compiler_params=pltpu.CompilerParams(
            # Both grid axes carry accumulator state across steps.
            # TODO(synk): on v7x, shard the row axis across the 2 TensorCores
            # (per-core column/scalar partials + a tiny combine pass).
            dimension_semantics=("arbitrary", "arbitrary")),
    )(temp2d, vis_feat, txt_t, cap_t)
    return out[0, 0]


def _reference_loss(vis_feat, text_feat, img_feat, cap_feat, temp):
    del img_feat  # unused by the original PyTorch forward
    scale = jnp.exp(temp.astype(jnp.float32))
    hi = jax.lax.Precision.HIGHEST
    l1 = jnp.matmul(vis_feat, text_feat.T, precision=hi).astype(jnp.float32) * scale
    l2 = jnp.matmul(vis_feat, cap_feat.T, precision=hi).astype(jnp.float32) * scale
    n = l1.shape[0]
    idx = jnp.arange(n)

    def ce(logits):
        lse = jax.scipy.special.logsumexp(logits, axis=1)
        return jnp.mean(lse - logits[idx, idx])

    return ce(l1) + ce(l1.T) + ce(l2) + ce(l2.T)


if __name__ == "__main__":
    key = jax.random.PRNGKey(0)
    k1, k2, k3, k4 = jax.random.split(key, 4)

    # Small-but-nontrivial shapes: batch N = 256, hidden D = 64.
    N, D = 256, 64
    vis_feat = jax.random.normal(k1, (N, D), dtype=jnp.float32)
    text_feat = jax.random.normal(k2, (N, D), dtype=jnp.float32)
    img_feat = jax.random.normal(k3, (N, D), dtype=jnp.float32)  # unused by module
    cap_feat = jax.random.normal(k4, (N, D), dtype=jnp.float32)
    temp = jnp.array(0.05, dtype=jnp.float32)

    ref = jax.block_until_ready(
        _reference_loss(vis_feat, text_feat, img_feat, cap_feat, temp))

    # Rectangular tiles (4x2 grid) exercise the global-offset diagonal test,
    # the online row/col accumulation and the init/finalize paths.
    loss_rect = jax.block_until_ready(
        nce_learnable_temp_loss_vs_vc(vis_feat, text_feat, img_feat, cap_feat,
                                      temp, block_m=64, block_n=128))
    assert jnp.allclose(loss_rect, ref, rtol=1e-3, atol=1e-3), (loss_rect, ref)

    # Square tiles (2x2 grid) as a second configuration.
    loss_sq = jax.block_until_ready(
        nce_learnable_temp_loss_vs_vc(vis_feat, text_feat, img_feat, cap_feat,
                                      temp, block_m=128, block_n=128))
    assert jnp.allclose(loss_sq, ref, rtol=1e-3, atol=1e-3), (loss_sq, ref)

    print("KERNEL_OK")
</pallas_src>

<mosaic_0001>
module attributes {stable_mosaic.version = 11 : i64} {
  func.func @_nce_vs_vc_kernel(%arg0: i32, %arg1: i32, %arg2: memref<1x1xf32, #tpu.memory_space<smem>>, %arg3: memref<64x64xf32, #tpu.memory_space<vmem>>, %arg4: memref<64x128xf32, #tpu.memory_space<vmem>>, %arg5: memref<64x128xf32, #tpu.memory_space<vmem>>, %arg6: memref<1x1xf32, #tpu.memory_space<vmem>>, %arg7: memref<64x1xf32, #tpu.memory_space<vmem>>, %arg8: memref<64x1xf32, #tpu.memory_space<vmem>>, %arg9: memref<64x1xf32, #tpu.memory_space<vmem>>, %arg10: memref<64x1xf32, #tpu.memory_space<vmem>>, %arg11: memref<2x1x128xf32, #tpu.memory_space<vmem>>, %arg12: memref<2x1x128xf32, #tpu.memory_space<vmem>>, %arg13: memref<2x1x128xf32, #tpu.memory_space<vmem>>, %arg14: memref<2x1x128xf32, #tpu.memory_space<vmem>>, %arg15: memref<1x1xf32, #tpu.memory_space<vmem>>) attributes {dimension_semantics = [#tpu.dimension_semantics<arbitrary>, #tpu.dimension_semantics<arbitrary>], iteration_bounds = array<i64: 4, 2>, scalar_prefetch = 0 : i64, scratch_operands = 9 : i64, tpu.core_type = #tpu.core_type<tc>, window_params = [{transform_indices = @transform_0, window_bounds = array<i64: 1, 1>}, {transform_indices = @transform_1, window_bounds = array<i64: 64, 64>}, {transform_indices = @transform_2, window_bounds = array<i64: 64, 128>}, {transform_indices = @transform_3, window_bounds = array<i64: 64, 128>}, {pipeline_mode = #tpu.pipeline_mode<synchronous>, transform_indices = @transform_4, window_bounds = array<i64: 1, 1>}]} {
    %c0_i32 = arith.constant 0 : i32
    %0 = arith.cmpi eq, %arg0, %c0_i32 : i32
    %c0_i32_0 = arith.constant 0 : i32
    %1 = arith.cmpi eq, %arg1, %c0_i32_0 : i32
    %2 = arith.andi %0, %1 : i1
    %3 = arith.extui %2 : i1 to i32
    %c0_i32_1 = arith.constant 0 : i32
    %4 = arith.cmpi ne, %3, %c0_i32_1 : i32
    scf.if %4 {
      %cst_61 = arith.constant 0.000000e+00 : f32
      %123 = vector.broadcast %cst_61 : f32 to vector<1x1xf32>
      %c0_62 = arith.constant 0 : index
      %c0_63 = arith.constant 0 : index
      %124 = vector.load %arg15[%c0_62, %c0_63] : memref<1x1xf32, #tpu.memory_space<vmem>>, vector<1x1xf32>
      tpu.vector_store %arg15[%c0_62, %c0_63], %123 {strides = array<i32>} : memref<1x1xf32, #tpu.memory_space<vmem>>, vector<1x1xf32>,
      %cst_64 = arith.constant 0xFF800000 : f32
      %125 = vector.broadcast %cst_64 : f32 to vector<2x1x128xf32>
      %c0_65 = arith.constant 0 : index
      %c0_66 = arith.constant 0 : index
      %c0_67 = arith.constant 0 : index
      %126 = vector.load %arg11[%c0_65, %c0_66, %c0_67] : memref<2x1x128xf32, #tpu.memory_space<vmem>>, vector<2x1x128xf32>
      tpu.vector_store %arg11[%c0_65, %c0_66, %c0_67], %125 {strides = array<i32>} : memref<2x1x128xf32, #tpu.memory_space<vmem>>, vector<2x1x128xf32>,
      %cst_68 = arith.constant 0.000000e+00 : f32
      %127 = vector.broadcast %cst_68 : f32 to vector<2x1x128xf32>
      %c0_69 = arith.constant 0 : index
      %c0_70 = arith.constant 0 : index
      %c0_71 = arith.constant 0 : index
      %128 = vector.load %arg12[%c0_69, %c0_70, %c0_71] : memref<2x1x128xf32, #tpu.memory_space<vmem>>, vector<2x1x128xf32>
      tpu.vector_store %arg12[%c0_69, %c0_70, %c0_71], %127 {strides = array<i32>} : memref<2x1x128xf32, #tpu.memory_space<vmem>>, vector<2x1x128xf32>,
      %cst_72 = arith.constant 0xFF800000 : f32
      %129 = vector.broadcast %cst_72 : f32 to vector<2x1x128xf32>
      %c0_73 = arith.constant 0 : index
      %c0_74 = arith.constant 0 : index
      %c0_75 = arith.constant 0 : index
      %130 = vector.load %arg13[%c0_73, %c0_74, %c0_75] : memref<2x1x128xf32, #tpu.memory_space<vmem>>, vector<2x1x128xf32>
      tpu.vector_store %arg13[%c0_73, %c0_74, %c0_75], %129 {strides = array<i32>} : memref<2x1x128xf32, #tpu.memory_space<vmem>>, vector<2x1x128xf32>,
      %cst_76 = arith.constant 0.000000e+00 : f32
      %131 = vector.broadcast %cst_76 : f32 to vector<2x1x128xf32>
      %c0_77 = arith.constant 0 : index
      %c0_78 = arith.constant 0 : index
      %c0_79 = arith.constant 0 : index
      %132 = vector.load %arg14[%c0_77, %c0_78, %c0_79] : memref<2x1x128xf32, #tpu.memory_space<vmem>>, vector<2x1x128xf32>
      tpu.vector_store %arg14[%c0_77, %c0_78, %c0_79], %131 {strides = array<i32>} : memref<2x1x128xf32, #tpu.memory_space<vmem>>, vector<2x1x128xf32>,
    } else {
    }
    %c0_i32_2 = arith.constant 0 : i32
    %5 = arith.cmpi eq, %arg1, %c0_i32_2 : i32
    %6 = arith.extui %5 : i1 to i32
    %c0_i32_3 = arith.constant 0 : i32
    %7 = arith.cmpi ne, %6, %c0_i32_3 : i32
    scf.if %7 {
      %cst_61 = arith.constant 0xFF800000 : f32
      %123 = vector.broadcast %cst_61 : f32 to vector<64x1xf32>
      %c0_62 = arith.constant 0 : index
      %c0_63 = arith.constant 0 : index
      %124 = vector.load %arg7[%c0_62, %c0_63] : memref<64x1xf32, #tpu.memory_space<vmem>>, vector<64x1xf32>
      tpu.vector_store %arg7[%c0_62, %c0_63], %123 {strides = array<i32>} : memref<64x1xf32, #tpu.memory_space<vmem>>, vector<64x1xf32>,
      %cst_64 = arith.constant 0.000000e+00 : f32
      %125 = vector.broadcast %cst_64 : f32 to vector<64x1xf32>
      %c0_65 = arith.constant 0 : index
      %c0_66 = arith.constant 0 : index
      %126 = vector.load %arg8[%c0_65, %c0_66] : memref<64x1xf32, #tpu.memory_space<vmem>>, vector<64x1xf32>
      tpu.vector_store %arg8[%c0_65, %c0_66], %125 {strides = array<i32>} : memref<64x1xf32, #tpu.memory_space<vmem>>, vector<64x1xf32>,
      %cst_67 = arith.constant 0xFF800000 : f32
      %127 = vector.broadcast %cst_67 : f32 to vector<64x1xf32>
      %c0_68 = arith.constant 0 : index
      %c0_69 = arith.constant 0 : index
      %128 = vector.load %arg9[%c0_68, %c0_69] : memref<64x1xf32, #tpu.memory_space<vmem>>, vector<64x1xf32>
      tpu.vector_store %arg9[%c0_68, %c0_69], %127 {strides = array<i32>} : memref<64x1xf32, #tpu.memory_space<vmem>>, vector<64x1xf32>,
      %cst_70 = arith.constant 0.000000e+00 : f32
      %129 = vector.broadcast %cst_70 : f32 to vector<64x1xf32>
      %c0_71 = arith.constant 0 : index
      %c0_72 = arith.constant 0 : index
      %130 = vector.load %arg10[%c0_71, %c0_72] : memref<64x1xf32, #tpu.memory_space<vmem>>, vector<64x1xf32>
      tpu.vector_store %arg10[%c0_71, %c0_72], %129 {strides = array<i32>} : memref<64x1xf32, #tpu.memory_space<vmem>>, vector<64x1xf32>,
    } else {
    }
    %c0 = arith.constant 0 : index
    %c0_4 = arith.constant 0 : index
    %8 = memref.load %arg2[%c0, %c0_4] : memref<1x1xf32, #tpu.memory_space<smem>>
    %9 = math.exp %8 : f32
    %c64_i32 = arith.constant 64 : i32
    %10 = arith.muli %arg0, %c64_i32 : i32
    %c128_i32 = arith.constant 128 : i32
    %11 = arith.muli %arg1, %c128_i32 : i32
    %c128_i32_5 = arith.constant 128 : i32
    %12 = arith.addi %11, %c128_i32_5 : i32
    %13 = arith.cmpi slt, %10, %12 : i32
    %c64_i32_6 = arith.constant 64 : i32
    %14 = arith.addi %10, %c64_i32_6 : i32
    %15 = arith.cmpi slt, %11, %14 : i32
    %16 = arith.andi %13, %15 : i1
    %c0_7 = arith.constant 0 : index
    %c0_8 = arith.constant 0 : index
    %17 = vector.load %arg3[%c0_7, %c0_8] : memref<64x64xf32, #tpu.memory_space<vmem>>, vector<64x64xf32>
    %c0_9 = arith.constant 0 : index
    %c0_10 = arith.constant 0 : index
    %18 = vector.load %arg4[%c0_9, %c0_10] : memref<64x128xf32, #tpu.memory_space<vmem>>, vector<64x128xf32>
    %cst = arith.constant dense<0.000000e+00> : vector<64x128xf32>
    %19 = tpu.matmul %17, %18, %cst {dimension_numbers = #tpu.dot_dimension_numbers<[1], [0], [0], [1], [0, 0, 1, 1], [], []>} : vector<64x64xf32>, vector<64x128xf32>, vector<64x128xf32> -> vector<64x128xf32>
    %20 = vector.broadcast %9 : f32 to vector<64x128xf32>
    %21 = arith.mulf %19, %20 : vector<64x128xf32>
    %22 = arith.extui %16 : i1 to i32
    %c0_i32_11 = arith.constant 0 : i32
    %23 = arith.cmpi ne, %22, %c0_i32_11 : i32
    scf.if %23 {
      %123 = tpu.iota {dimensions = array<i32: 0>} : vector<64x128xi32>
      %124 = vector.broadcast %10 : i32 to vector<64x128xi32>
      %125 = arith.addi %123, %124 : vector<64x128xi32>
      %126 = tpu.iota {dimensions = array<i32: 1>} : vector<64x128xi32>
      %127 = vector.broadcast %11 : i32 to vector<64x128xi32>
      %128 = arith.addi %126, %127 : vector<64x128xi32>
      %129 = arith.cmpi eq, %125, %128 : vector<64x128xi32>
      %cst_61 = arith.constant 0.000000e+00 : f32
      %130 = vector.broadcast %cst_61 : f32 to vector<64x128xf32>
      %131 = arith.select %129, %21, %130 : vector<64x128xi1>, vector<64x128xf32>
      %132 = vector.shape_cast %131 : vector<64x128xf32> to vector<1x64x128xf32>
      %cst_62 = arith.constant dense<0.000000e+00> : vector<1xf32>
      %133 = vector.multi_reduction <add>, %132, %cst_62 [1, 2] : vector<1x64x128xf32> to vector<1xf32>
      %134 = vector.shape_cast %133 : vector<1xf32> to vector<1x1x1xf32>
      %135 = vector.extract %134[0, 0, 0] : f32 from vector<1x1x1xf32>
      %c0_63 = arith.constant 0 : index
      %c0_64 = arith.constant 0 : index
      %136 = vector.load %arg15[%c0_63, %c0_64] : memref<1x1xf32, #tpu.memory_space<vmem>>, vector<1x1xf32>
      %cst_65 = arith.constant 2.000000e+00 : f32
      %137 = arith.mulf %cst_65, %135 : f32
      %138 = vector.broadcast %137 : f32 to vector<1x1xf32>
      %139 = arith.subf %136, %138 : vector<1x1xf32>
      %c0_66 = arith.constant 0 : index
      %c0_67 = arith.constant 0 : index
      %140 = vector.load %arg15[%c0_66, %c0_67] : memref<1x1xf32, #tpu.memory_space<vmem>>, vector<1x1xf32>
      tpu.vector_store %arg15[%c0_66, %c0_67], %139 {strides = array<i32>} : memref<1x1xf32, #tpu.memory_space<vmem>>, vector<1x1xf32>,
    } else {
    }
    %c0_12 = arith.constant 0 : index
    %c0_13 = arith.constant 0 : index
    %24 = vector.load %arg7[%c0_12, %c0_13] : memref<64x1xf32, #tpu.memory_space<vmem>>, vector<64x1xf32>
    %cst_14 = arith.constant dense<0xFF800000> : vector<64xf32>
    %25 = vector.multi_reduction <maximumf>, %21, %cst_14 [1] : vector<64x128xf32> to vector<64xf32>
    %26 = vector.shape_cast %25 : vector<64xf32> to vector<64x1xf32>
    %27 = arith.maximumf %24, %26 : vector<64x1xf32>
    %28 = vector.broadcast %27 : vector<64x1xf32> to vector<64x128xf32>
    %29 = arith.subf %21, %28 : vector<64x128xf32>
    %30 = math.exp %29 : vector<64x128xf32>
    %c0_15 = arith.constant 0 : index
    %c0_16 = arith.constant 0 : index
    %31 = vector.load %arg8[%c0_15, %c0_16] : memref<64x1xf32, #tpu.memory_space<vmem>>, vector<64x1xf32>
    %32 = arith.subf %24, %27 : vector<64x1xf32>
    %33 = math.exp %32 : vector<64x1xf32>
    %34 = arith.mulf %31, %33 : vector<64x1xf32>
    %cst_17 = arith.constant dense<0.000000e+00> : vector<64xf32>
    %35 = vector.multi_reduction <add>, %30, %cst_17 [1] : vector<64x128xf32> to vector<64xf32>
    %36 = vector.shape_cast %35 : vector<64xf32> to vector<64x1xf32>
    %37 = arith.addf %34, %36 : vector<64x1xf32>
    %c0_18 = arith.constant 0 : index
    %c0_19 = arith.constant 0 : index
    %38 = vector.load %arg8[%c0_18, %c0_19] : memref<64x1xf32, #tpu.memory_space<vmem>>, vector<64x1xf32>
    tpu.vector_store %arg8[%c0_18, %c0_19], %37 {strides = array<i32>} : memref<64x1xf32, #tpu.memory_space<vmem>>, vector<64x1xf32>,
    %c0_20 = arith.constant 0 : index
    %c0_21 = arith.constant 0 : index
    %39 = vector.load %arg7[%c0_20, %c0_21] : memref<64x1xf32, #tpu.memory_space<vmem>>, vector<64x1xf32>
    tpu.vector_store %arg7[%c0_20, %c0_21], %27 {strides = array<i32>} : memref<64x1xf32, #tpu.memory_space<vmem>>, vector<64x1xf32>,
    %40 = arith.index_cast %arg1 : i32 to index
    %c0_22 = arith.constant 0 : index
    %c0_23 = arith.constant 0 : index
    %41 = vector.load %arg11[%40, %c0_22, %c0_23] : memref<2x1x128xf32, #tpu.memory_space<vmem>>, vector<1x1x128xf32>
    %42 = vector.shape_cast %41 : vector<1x1x128xf32> to vector<1x128xf32>
    %cst_24 = arith.constant dense<0xFF800000> : vector<128xf32>
    %43 = vector.multi_reduction <maximumf>, %21, %cst_24 [0] : vector<64x128xf32> to vector<128xf32>
    %44 = vector.shape_cast %43 : vector<128xf32> to vector<1x128xf32>
    %45 = arith.maximumf %42, %44 : vector<1x128xf32>
    %46 = vector.broadcast %45 : vector<1x128xf32> to vector<64x128xf32>
    %47 = arith.subf %21, %46 : vector<64x128xf32>
    %48 = math.exp %47 : vector<64x128xf32>
    %49 = arith.index_cast %arg1 : i32 to index
    %c0_25 = arith.constant 0 : index
    %c0_26 = arith.constant 0 : index
    %50 = vector.load %arg12[%49, %c0_25, %c0_26] : memref<2x1x128xf32, #tpu.memory_space<vmem>>, vector<1x1x128xf32>
    %51 = vector.shape_cast %50 : vector<1x1x128xf32> to vector<1x128xf32>
    %52 = arith.subf %42, %45 : vector<1x128xf32>
    %53 = math.exp %52 : vector<1x128xf32>
    %54 = arith.mulf %51, %53 : vector<1x128xf32>
    %cst_27 = arith.constant dense<0.000000e+00> : vector<128xf32>
    %55 = vector.multi_reduction <add>, %48, %cst_27 [0] : vector<64x128xf32> to vector<128xf32>
    %56 = vector.shape_cast %55 : vector<128xf32> to vector<1x128xf32>
    %57 = arith.addf %54, %56 : vector<1x128xf32>
    %58 = arith.index_cast %arg1 : i32 to index
    %c0_28 = arith.constant 0 : index
    %c0_29 = arith.constant 0 : index
    %59 = vector.load %arg12[%58, %c0_28, %c0_29] : memref<2x1x128xf32, #tpu.memory_space<vmem>>, vector<1x1x128xf32>
    %60 = vector.shape_cast %59 : vector<1x1x128xf32> to vector<1x128xf32>
    %61 = vector.shape_cast %57 : vector<1x128xf32> to vector<1x1x128xf32>
    tpu.vector_store %arg12[%58, %c0_28, %c0_29], %61 {strides = array<i32>} : memref<2x1x128xf32, #tpu.memory_space<vmem>>, vector<1x1x128xf32>,
    %62 = arith.index_cast %arg1 : i32 to index
    %c0_30 = arith.constant 0 : index
    %c0_31 = arith.constant 0 : index
    %63 = vector.load %arg11[%62, %c0_30, %c0_31] : memref<2x1x128xf32, #tpu.memory_space<vmem>>, vector<1x1x128xf32>
    %64 = vector.shape_cast %63 : vector<1x1x128xf32> to vector<1x128xf32>
    %65 = vector.shape_cast %45 : vector<1x128xf32> to vector<1x1x128xf32>
    tpu.vector_store %arg11[%62, %c0_30, %c0_31], %65 {strides = array<i32>} : memref<2x1x128xf32, #tpu.memory_space<vmem>>, vector<1x1x128xf32>,
    %c0_32 = arith.constant 0 : index
    %c0_33 = arith.constant 0 : index
    %66 = vector.load %arg3[%c0_32, %c0_33] : memref<64x64xf32, #tpu.memory_space<vmem>>, vector<64x64xf32>
    %c0_34 = arith.constant 0 : index
    %c0_35 = arith.constant 0 : index
    %67 = vector.load %arg5[%c0_34, %c0_35] : memref<64x128xf32, #tpu.memory_space<vmem>>, vector<64x128xf32>
    %cst_36 = arith.constant dense<0.000000e+00> : vector<64x128xf32>
    %68 = tpu.matmul %66, %67, %cst_36 {dimension_numbers = #tpu.dot_dimension_numbers<[1], [0], [0], [1], [0, 0, 1, 1], [], []>} : vector<64x64xf32>, vector<64x128xf32>, vector<64x128xf32> -> vector<64x128xf32>
    %69 = vector.broadcast %9 : f32 to vector<64x128xf32>
    %70 = arith.mulf %68, %69 : vector<64x128xf32>
    %71 = arith.extui %16 : i1 to i32
    %c0_i32_37 = arith.constant 0 : i32
    %72 = arith.cmpi ne, %71, %c0_i32_37 : i32
    scf.if %72 {
      %123 = tpu.iota {dimensions = array<i32: 0>} : vector<64x128xi32>
      %124 = vector.broadcast %10 : i32 to vector<64x128xi32>
      %125 = arith.addi %123, %124 : vector<64x128xi32>
      %126 = tpu.iota {dimensions = array<i32: 1>} : vector<64x128xi32>
      %127 = vector.broadcast %11 : i32 to vector<64x128xi32>
      %128 = arith.addi %126, %127 : vector<64x128xi32>
      %129 = arith.cmpi eq, %125, %128 : vector<64x128xi32>
      %cst_61 = arith.constant 0.000000e+00 : f32
      %130 = vector.broadcast %cst_61 : f32 to vector<64x128xf32>
      %131 = arith.select %129, %70, %130 : vector<64x128xi1>, vector<64x128xf32>
      %132 = vector.shape_cast %131 : vector<64x128xf32> to vector<1x64x128xf32>
      %cst_62 = arith.constant dense<0.000000e+00> : vector<1xf32>
      %133 = vector.multi_reduction <add>, %132, %cst_62 [1, 2] : vector<1x64x128xf32> to vector<1xf32>
      %134 = vector.shape_cast %133 : vector<1xf32> to vector<1x1x1xf32>
      %135 = vector.extract %134[0, 0, 0] : f32 from vector<1x1x1xf32>
      %c0_63 = arith.constant 0 : index
      %c0_64 = arith.constant 0 : index
      %136 = vector.load %arg15[%c0_63, %c0_64] : memref<1x1xf32, #tpu.memory_space<vmem>>, vector<1x1xf32>
      %cst_65 = arith.constant 2.000000e+00 : f32
      %137 = arith.mulf %cst_65, %135 : f32
      %138 = vector.broadcast %137 : f32 to vector<1x1xf32>
      %139 = arith.subf %136, %138 : vector<1x1xf32>
      %c0_66 = arith.constant 0 : index
      %c0_67 = arith.constant 0 : index
      %140 = vector.load %arg15[%c0_66, %c0_67] : memref<1x1xf32, #tpu.memory_space<vmem>>, vector<1x1xf32>
      tpu.vector_store %arg15[%c0_66, %c0_67], %139 {strides = array<i32>} : memref<1x1xf32, #tpu.memory_space<vmem>>, vector<1x1xf32>,
    } else {
    }
    %c0_38 = arith.constant 0 : index
    %c0_39 = arith.constant 0 : index
    %73 = vector.load %arg9[%c0_38, %c0_39] : memref<64x1xf32, #tpu.memory_space<vmem>>, vector<64x1xf32>
    %cst_40 = arith.constant dense<0xFF800000> : vector<64xf32>
    %74 = vector.multi_reduction <maximumf>, %70, %cst_40 [1] : vector<64x128xf32> to vector<64xf32>
    %75 = vector.shape_cast %74 : vector<64xf32> to vector<64x1xf32>
    %76 = arith.maximumf %73, %75 : vector<64x1xf32>
    %77 = vector.broadcast %76 : vector<64x1xf32> to vector<64x128xf32>
    %78 = arith.subf %70, %77 : vector<64x128xf32>
    %79 = math.exp %78 : vector<64x128xf32>
    %c0_41 = arith.constant 0 : index
    %c0_42 = arith.constant 0 : index
    %80 = vector.load %arg10[%c0_41, %c0_42] : memref<64x1xf32, #tpu.memory_space<vmem>>, vector<64x1xf32>
    %81 = arith.subf %73, %76 : vector<64x1xf32>
    %82 = math.exp %81 : vector<64x1xf32>
    %83 = arith.mulf %80, %82 : vector<64x1xf32>
    %cst_43 = arith.constant dense<0.000000e+00> : vector<64xf32>
    %84 = vector.multi_reduction <add>, %79, %cst_43 [1] : vector<64x128xf32> to vector<64xf32>
    %85 = vector.shape_cast %84 : vector<64xf32> to vector<64x1xf32>
    %86 = arith.addf %83, %85 : vector<64x1xf32>
    %c0_44 = arith.constant 0 : index
    %c0_45 = arith.constant 0 : index
    %87 = vector.load %arg10[%c0_44, %c0_45] : memref<64x1xf32, #tpu.memory_space<vmem>>, vector<64x1xf32>
    tpu.vector_store %arg10[%c0_44, %c0_45], %86 {strides = array<i32>} : memref<64x1xf32, #tpu.memory_space<vmem>>, vector<64x1xf32>,
    %c0_46 = arith.constant 0 : index
    %c0_47 = arith.constant 0 : index
    %88 = vector.load %arg9[%c0_46, %c0_47] : memref<64x1xf32, #tpu.memory_space<vmem>>, vector<64x1xf32>
    tpu.vector_store %arg9[%c0_46, %c0_47], %76 {strides = array<i32>} : memref<64x1xf32, #tpu.memory_space<vmem>>, vector<64x1xf32>,
    %89 = arith.index_cast %arg1 : i32 to index
    %c0_48 = arith.constant 0 : index
    %c0_49 = arith.constant 0 : index
    %90 = vector.load %arg13[%89, %c0_48, %c0_49] : memref<2x1x128xf32, #tpu.memory_space<vmem>>, vector<1x1x128xf32>
    %91 = vector.shape_cast %90 : vector<1x1x128xf32> to vector<1x128xf32>
    %cst_50 = arith.constant dense<0xFF800000> : vector<128xf32>
    %92 = vector.multi_reduction <maximumf>, %70, %cst_50 [0] : vector<64x128xf32> to vector<128xf32>
    %93 = vector.shape_cast %92 : vector<128xf32> to vector<1x128xf32>
    %94 = arith.maximumf %91, %93 : vector<1x128xf32>
    %95 = vector.broadcast %94 : vector<1x128xf32> to vector<64x128xf32>
    %96 = arith.subf %70, %95 : vector<64x128xf32>
    %97 = math.exp %96 : vector<64x128xf32>
    %98 = arith.index_cast %arg1 : i32 to index
    %c0_51 = arith.constant 0 : index
    %c0_52 = arith.constant 0 : index
    %99 = vector.load %arg14[%98, %c0_51, %c0_52] : memref<2x1x128xf32, #tpu.memory_space<vmem>>, vector<1x1x128xf32>
    %100 = vector.shape_cast %99 : vector<1x1x128xf32> to vector<1x128xf32>
    %101 = arith.subf %91, %94 : vector<1x128xf32>
    %102 = math.exp %101 : vector<1x128xf32>
    %103 = arith.mulf %100, %102 : vector<1x128xf32>
    %cst_53 = arith.constant dense<0.000000e+00> : vector<128xf32>
    %104 = vector.multi_reduction <add>, %97, %cst_53 [0] : vector<64x128xf32> to vector<128xf32>
    %105 = vector.shape_cast %104 : vector<128xf32> to vector<1x128xf32>
    %106 = arith.addf %103, %105 : vector<1x128xf32>
    %107 = arith.index_cast %arg1 : i32 to index
    %c0_54 = arith.constant 0 : index
    %c0_55 = arith.constant 0 : index
    %108 = vector.load %arg14[%107, %c0_54, %c0_55] : memref<2x1x128xf32, #tpu.memory_space<vmem>>, vector<1x1x128xf32>
    %109 = vector.shape_cast %108 : vector<1x1x128xf32> to vector<1x128xf32>
    %110 = vector.shape_cast %106 : vector<1x128xf32> to vector<1x1x128xf32>
    tpu.vector_store %arg14[%107, %c0_54, %c0_55], %110 {strides = array<i32>} : memref<2x1x128xf32, #tpu.memory_space<vmem>>, vector<1x1x128xf32>,
    %111 = arith.index_cast %arg1 : i32 to index
    %c0_56 = arith.constant 0 : index
    %c0_57 = arith.constant 0 : index
    %112 = vector.load %arg13[%111, %c0_56, %c0_57] : memref<2x1x128xf32, #tpu.memory_space<vmem>>, vector<1x1x128xf32>
    %113 = vector.shape_cast %112 : vector<1x1x128xf32> to vector<1x128xf32>
    %114 = vector.shape_cast %94 : vector<1x128xf32> to vector<1x1x128xf32>
    tpu.vector_store %arg13[%111, %c0_56, %c0_57], %114 {strides = array<i32>} : memref<2x1x128xf32, #tpu.memory_space<vmem>>, vector<1x1x128xf32>,
    %c1_i32 = arith.constant 1 : i32
    %115 = arith.cmpi eq, %arg1, %c1_i32 : i32
    %116 = arith.extui %115 : i1 to i32
    %c0_i32_58 = arith.constant 0 : i32
    %117 = arith.cmpi ne, %116, %c0_i32_58 : i32
    scf.if %117 {
      %c0_61 = arith.constant 0 : index
      %c0_62 = arith.constant 0 : index
      %123 = vector.load %arg7[%c0_61, %c0_62] : memref<64x1xf32, #tpu.memory_space<vmem>>, vector<64x1xf32>
      %c0_63 = arith.constant 0 : index
      %c0_64 = arith.constant 0 : index
      %124 = vector.load %arg8[%c0_63, %c0_64] : memref<64x1xf32, #tpu.memory_space<vmem>>, vector<64x1xf32>
      %125 = math.log %124 : vector<64x1xf32>
      %126 = arith.addf %123, %125 : vector<64x1xf32>
      %127 = vector.shape_cast %126 : vector<64x1xf32> to vector<1x64x1xf32>
      %cst_65 = arith.constant dense<0.000000e+00> : vector<1xf32>
      %128 = vector.multi_reduction <add>, %127, %cst_65 [1, 2] : vector<1x64x1xf32> to vector<1xf32>
      %129 = vector.shape_cast %128 : vector<1xf32> to vector<1x1x1xf32>
      %130 = vector.extract %129[0, 0, 0] : f32 from vector<1x1x1xf32>
      %c0_66 = arith.constant 0 : index
      %c0_67 = arith.constant 0 : index
      %131 = vector.load %arg9[%c0_66, %c0_67] : memref<64x1xf32, #tpu.memory_space<vmem>>, vector<64x1xf32>
      %c0_68 = arith.constant 0 : index
      %c0_69 = arith.constant 0 : index
      %132 = vector.load %arg10[%c0_68, %c0_69] : memref<64x1xf32, #tpu.memory_space<vmem>>, vector<64x1xf32>
      %133 = math.log %132 : vector<64x1xf32>
      %134 = arith.addf %131, %133 : vector<64x1xf32>
      %135 = vector.shape_cast %134 : vector<64x1xf32> to vector<1x64x1xf32>
      %cst_70 = arith.constant dense<0.000000e+00> : vector<1xf32>
      %136 = vector.multi_reduction <add>, %135, %cst_70 [1, 2] : vector<1x64x1xf32> to vector<1xf32>
      %137 = vector.shape_cast %136 : vector<1xf32> to vector<1x1x1xf32>
      %138 = vector.extract %137[0, 0, 0] : f32 from vector<1x1x1xf32>
      %139 = arith.addf %130, %138 : f32
      %c0_71 = arith.constant 0 : index
      %c0_72 = arith.constant 0 : index
      %140 = vector.load %arg15[%c0_71, %c0_72] : memref<1x1xf32, #tpu.memory_space<vmem>>, vector<1x1xf32>
      %141 = vector.broadcast %139 : f32 to vector<1x1xf32>
      %142 = arith.addf %140, %141 : vector<1x1xf32>
      %c0_73 = arith.constant 0 : index
      %c0_74 = arith.constant 0 : index
      %143 = vector.load %arg15[%c0_73, %c0_74] : memref<1x1xf32, #tpu.memory_space<vmem>>, vector<1x1xf32>
      tpu.vector_store %arg15[%c0_73, %c0_74], %142 {strides = array<i32>} : memref<1x1xf32, #tpu.memory_space<vmem>>, vector<1x1xf32>,
    } else {
    }
    %c3_i32 = arith.constant 3 : i32
    %118 = arith.cmpi eq, %arg0, %c3_i32 : i32
    %c1_i32_59 = arith.constant 1 : i32
    %119 = arith.cmpi eq, %arg1, %c1_i32_59 : i32
    %120 = arith.andi %118, %119 : i1
    %121 = arith.extui %120 : i1 to i32
    %c0_i32_60 = arith.constant 0 : i32
    %122 = arith.cmpi ne, %121, %c0_i32_60 : i32
    scf.if %122 {
      %c0_61 = arith.constant 0 : index
      %c0_62 = arith.constant 0 : index
      %c0_63 = arith.constant 0 : index
      %123 = vector.load %arg11[%c0_61, %c0_62, %c0_63] : memref<2x1x128xf32, #tpu.memory_space<vmem>>, vector<2x1x128xf32>
      %c0_64 = arith.constant 0 : index
      %c0_65 = arith.constant 0 : index
      %c0_66 = arith.constant 0 : index
      %124 = vector.load %arg12[%c0_64, %c0_65, %c0_66] : memref<2x1x128xf32, #tpu.memory_space<vmem>>, vector<2x1x128xf32>
      %125 = math.log %124 : vector<2x1x128xf32>
      %126 = arith.addf %123, %125 : vector<2x1x128xf32>
      %127 = vector.shape_cast %126 : vector<2x1x128xf32> to vector<1x2x1x128xf32>
      %cst_67 = arith.constant dense<0.000000e+00> : vector<1xf32>
      %128 = vector.multi_reduction <add>, %127, %cst_67 [1, 2, 3] : vector<1x2x1x128xf32> to vector<1xf32>
      %129 = vector.shape_cast %128 : vector<1xf32> to vector<1x1x1x1xf32>
      %130 = vector.extract %129[0, 0, 0, 0] : f32 from vector<1x1x1x1xf32>
      %c0_68 = arith.constant 0 : index
      %c0_69 = arith.constant 0 : index
      %c0_70 = arith.constant 0 : index
      %131 = vector.load %arg13[%c0_68, %c0_69, %c0_70] : memref<2x1x128xf32, #tpu.memory_space<vmem>>, vector<2x1x128xf32>
      %c0_71 = arith.constant 0 : index
      %c0_72 = arith.constant 0 : index
      %c0_73 = arith.constant 0 : index
      %132 = vector.load %arg14[%c0_71, %c0_72, %c0_73] : memref<2x1x128xf32, #tpu.memory_space<vmem>>, vector<2x1x128xf32>
      %133 = math.log %132 : vector<2x1x128xf32>
      %134 = arith.addf %131, %133 : vector<2x1x128xf32>
      %135 = vector.shape_cast %134 : vector<2x1x128xf32> to vector<1x2x1x128xf32>
      %cst_74 = arith.constant dense<0.000000e+00> : vector<1xf32>
      %136 = vector.multi_reduction <add>, %135, %cst_74 [1, 2, 3] : vector<1x2x1x128xf32> to vector<1xf32>
      %137 = vector.shape_cast %136 : vector<1xf32> to vector<1x1x1x1xf32>
      %138 = vector.extract %137[0, 0, 0, 0] : f32 from vector<1x1x1x1xf32>
      %139 = arith.addf %130, %138 : f32
      %c0_75 = arith.constant 0 : index
      %c0_76 = arith.constant 0 : index
      %140 = vector.load %arg15[%c0_75, %c0_76] : memref<1x1xf32, #tpu.memory_space<vmem>>, vector<1x1xf32>
      %141 = vector.broadcast %139 : f32 to vector<1x1xf32>
      %142 = arith.addf %140, %141 : vector<1x1xf32>
      %cst_77 = arith.constant 3.906250e-03 : f32
      %143 = vector.broadcast %cst_77 : f32 to vector<1x1xf32>
      %144 = arith.mulf %142, %143 : vector<1x1xf32>
      %c0_78 = arith.constant 0 : index
      %c0_79 = arith.constant 0 : index
      %145 = vector.load %arg6[%c0_78, %c0_79] : memref<1x1xf32, #tpu.memory_space<vmem>>, vector<1x1xf32>
      tpu.vector_store %arg6[%c0_78, %c0_79], %144 {strides = array<i32>} : memref<1x1xf32, #tpu.memory_space<vmem>>, vector<1x1xf32>,
    } else {
    }
    return
  }
  func.func @transform_0(%arg0: i32, %arg1: i32) -> (i32, i32) {
    %c0_i32 = arith.constant 0 : i32
    %c0_i32_0 = arith.constant 0 : i32
    %c0_i32_1 = arith.constant 0 : i32
    return %c0_i32, %c0_i32_0 : i32, i32
  }
  func.func @transform_1(%arg0: i32, %arg1: i32) -> (i32, i32) {
    %c0_i32 = arith.constant 0 : i32
    %c0_i32_0 = arith.constant 0 : i32
    return %arg0, %c0_i32 : i32, i32
  }
  func.func @transform_2(%arg0: i32, %arg1: i32) -> (i32, i32) {
    %c0_i32 = arith.constant 0 : i32
    %c0_i32_0 = arith.constant 0 : i32
    return %c0_i32, %arg1 : i32, i32
  }
  func.func @transform_3(%arg0: i32, %arg1: i32) -> (i32, i32) {
    %c0_i32 = arith.constant 0 : i32
    %c0_i32_0 = arith.constant 0 : i32
    return %c0_i32, %arg1 : i32, i32
  }
  func.func @transform_4(%arg0: i32, %arg1: i32) -> (i32, i32) {
    %c0_i32 = arith.constant 0 : i32
    %c0_i32_0 = arith.constant 0 : i32
    %c0_i32_1 = arith.constant 0 : i32
    return %c0_i32, %c0_i32_0 : i32, i32
  }
}

</mosaic_0001>

<bundles_post_ra>
// kernel: tpu_custom_call.1
= control target key start
LH: loop header
LB: loop body
LE: loop exit
PB: predicated region body
PF: predicated region fallthrough
CT: control target
= control target key end

     0   :  { %s2537_s0 = inlined_call_operand.<no memory space> [shape: f32[1,1], index: 0, kind: input, shape index: {}]   ;;  %s2538_s1 = inlined_call_operand.vmem [shape: f32[256,64], index: 1, kind: input, shape index: {}]   ;;  %s2539_s2 = inlined_call_operand.vmem [shape: f32[64,256], index: 2, kind: input, shape index: {}]   ;;  %s2540_s3 = inlined_call_operand.vmem [shape: f32[64,256], index: 3, kind: input, shape index: {}]   ;;  %s2541_s4 = inlined_call_operand.hbm [shape: f32[1,1], index: 4, kind: output, shape index: {}]  }
   0x1   :  { %9 = sst [smem:[#allocation11]] %s2537_s0 }
   0x2   :  { %10 = vsyncpa [#allocation15], 0  ;;  %s1916_s17 = smov 0   ;;  %s1918_s18 = smov 0  }
   0x3   :  { %s1920_s19 = smov 0   ;;  %s1922_s20 = smov 0  }
   0x4   :  { %s1924_s21 = smov 0   ;;  %s1926_s22 = smov 0  }
   0x5   :  { %s1928_s23 = smov 0  }
   0x6 LB: > { %s1512_s0 = sadd.s32 4294967295, %s1880_s23   ;;  %s25_s24 = sadd.s32 1, %s1872_s21  ;;  %s1880_s23 = sphi %s1928_s23, %s16_s23   ;;  %s1876_s22 = sphi %s1926_s22, %s2550_s22   ;;  %s1872_s21 = sphi %s1924_s21, %s2549_s21   ;;  %s1868_s20 = sphi %s1922_s20, %s2548_s20   ;;  %s1864_s19 = sphi %s1920_s19, %s2547_s19   ;;  %s1860_s18 = sphi %s1918_s18, %s2546_s18   ;;  %s1856_s17 = sphi %s1916_s17, %s2545_s17  }
   0x7   : > { %p26_p0 = scmp.ge.s32.totalorder %s25_s24, 2  ;;  %s28_s25 = sadd.s32 1, %s1876_s22 }
   0x8   : > { %s82_s26 = sadd.s32 1, %s1860_s18  ;;  %p89_p1 = scmp.ne.s32.totalorder %s1860_s18, %s1856_s17 }
   0x9   : > { %s2552_s24 = smov (%p26_p0, %s25_s24), 0  ;;  %s2554_s25 = smov (!%p26_p0, %s28_s25), %s1876_s22 }
   0xa   : > { %s79_s27 = ssub.s32 %s1872_s21, %s2552_s24  ;;  %p90_p2 = scmp.eq.s32.totalorder %s1880_s23, 0 }
   0xb   : > { %p30_p3 = scmp.ge.s32.totalorder %s2554_s25, 4  ;;  %p80_p4 = scmp.eq.s32.totalorder %s79_s27, 0 }
   0xc   : > { %p1963_p5 = por %p90_p2, %p89_p1  ;;  %p1514_p6 = scmp.ge.s32.totalorder %s1880_s23, 8 }
   0xd   : > { %s2556_s25 = smov (%p30_p3, %s2554_s25), 0 }
   0xe   : > { %s1970_s29 = scalar_select %p80_p4, %s1860_s18, %s82_s26  }
   0xf   : > { %165 = sbr.rel (%p1514_p6) target bundleno = 44 (0x2c), region = 20 }
  0x14   : > { %177 = sbr.rel (!%p1963_p5) target bundleno = 32 (0x20), region = 28  ;;  %s179_s30 = sand.u32 (%p1963_p5), 1, %s1860_s18  }
  0x15   : > { %s1516_s5 = sshll.u32 (%p1963_p5), %s1872_s21, 3  ;;  %s1515_s6 = sshll.u32 (%p1963_p5), %s179_s30, 6 }
  0x16   : > { %s183_s9 = scalar_lea.vmem (%p1963_p5), %s2539_s2, %s1516_s5  ;;  %s181_s10 = scalar_lea.vmem (%p1963_p5), [#allocation12], %s1515_s6 }
  0x17   : > { %v226_v0 = vld [vmem:[%s183_s9] sm:$0xff] (%p1963_p5)  ;;  %v228_v1 = vld [vmem:[%s183_s9 + $0x10] sm:$0xff] (%p1963_p5) }
  0x18   : > { %v230_v2 = vld [vmem:[%s183_s9 + $0x20] sm:$0xff] (%p1963_p5)  ;;  %227 = vst [vmem:[%s181_s10] sm:$0xff] (%p1963_p5), %v226_v0  ;;  %v232_v3 = vld [vmem:[%s183_s9 + $0x30] sm:$0xff] (%p1963_p5) }
  0x19   : > { %229 = vst [vmem:[%s181_s10 + $0x8] sm:$0xff] %v228_v1  ;;  %v234_v4 = vld [vmem:[%s183_s9 + $0x40] sm:$0xff]  ;;  %v236_v5 = vld [vmem:[%s183_s9 + $0x50] sm:$0xff] }
  0x1a   : > { %231 = vst [vmem:[%s181_s10 + $0x10] sm:$0xff] %v230_v2  ;;  %v238_v6 = vld [vmem:[%s183_s9 + $0x60] sm:$0xff]  ;;  %v240_v7 = vld [vmem:[%s183_s9 + $0x70] sm:$0xff] }
  0x1b   : > { %233 = vst [vmem:[%s181_s10 + $0x18] sm:$0xff] %v232_v3 }
  0x1c   : > { %235 = vst [vmem:[%s181_s10 + $0x20] sm:$0xff] %v234_v4 }
  0x1d   : > { %237 = vst [vmem:[%s181_s10 + $0x28] sm:$0xff] %v236_v5 }
  0x1e   : > { %239 = vst [vmem:[%s181_s10 + $0x30] sm:$0xff] %v238_v6 }
  0x1f   : > { %241 = vst [vmem:[%s181_s10 + $0x38] sm:$0xff] %v240_v7 }
  0x20 PF: > { %247 = sbr.rel (!%p1963_p5) target bundleno = 44 (0x2c), region = 66  ;;  %s249_s11 = sand.u32 (%p1963_p5), 1, %s1860_s18  }
  0x21   : > { %s1518_s12 = sshll.u32 (%p1963_p5), %s1872_s21, 3  ;;  %s1517_s13 = sshll.u32 (%p1963_p5), %s249_s11, 6 }
  0x22   : > { %s253_s16 = scalar_lea.vmem (%p1963_p5), %s2540_s3, %s1518_s12  ;;  %s251_s26 = scalar_lea.vmem (%p1963_p5), [#allocation13], %s1517_s13 }
  0x23   : > { %v296_v8 = vld [vmem:[%s253_s16] sm:$0xff] (%p1963_p5)  ;;  %v298_v9 = vld [vmem:[%s253_s16 + $0x10] sm:$0xff] (%p1963_p5) }
  0x24   : > { %v300_v10 = vld [vmem:[%s253_s16 + $0x20] sm:$0xff] (%p1963_p5)  ;;  %297 = vst [vmem:[%s251_s26] sm:$0xff] (%p1963_p5), %v296_v8  ;;  %v302_v11 = vld [vmem:[%s253_s16 + $0x30] sm:$0xff] (%p1963_p5) }
  0x25   : > { %299 = vst [vmem:[%s251_s26 + $0x8] sm:$0xff] %v298_v9  ;;  %v304_v12 = vld [vmem:[%s253_s16 + $0x40] sm:$0xff]  ;;  %v306_v13 = vld [vmem:[%s253_s16 + $0x50] sm:$0xff] }
  0x26   : > { %301 = vst [vmem:[%s251_s26 + $0x10] sm:$0xff] %v300_v10  ;;  %v308_v14 = vld [vmem:[%s253_s16 + $0x60] sm:$0xff]  ;;  %v310_v15 = vld [vmem:[%s253_s16 + $0x70] sm:$0xff] }
  0x27   : > { %303 = vst [vmem:[%s251_s26 + $0x18] sm:$0xff] %v302_v11 }
  0x28   : > { %305 = vst [vmem:[%s251_s26 + $0x20] sm:$0xff] %v304_v12 }
  0x29   : > { %307 = vst [vmem:[%s251_s26 + $0x28] sm:$0xff] %v306_v13 }
  0x2a   : > { %309 = vst [vmem:[%s251_s26 + $0x30] sm:$0xff] %v308_v14 }
  0x2b   : > { %311 = vst [vmem:[%s251_s26 + $0x38] sm:$0xff] %v310_v15 }
  0x2c PF: > { %p1519_p7 = scmp.ge.s32.totalorder %s1880_s23, 1  ;;  %p316_p8 = scmp.lt.s32.totalorder %s1880_s23, 9 }
  0x2e   : > { %p317_p9 = pnand %p1519_p7, %p316_p8 }
  0x2f   : > { %s323_s27 = sand.u32 (!%p317_p9), 1, %s1856_s17   ;;  %s1522_s28 = sshll.u32 (!%p317_p9), %s1868_s20, 3 }
  0x30   : > { %320 = sbr.rel (%p317_p9) target bundleno = 1919 (0x77f), region = 104  ;;  %s1520_s30 = sshll.u32 (!%p317_p9), %s323_s27, 6 }
  0x31   : > { %p360_p10 = scmp.lt.s32.totalorder (!%p317_p9), %s1522_s28, 31  ;;  %p365_p11 = scmp.eq.s32.totalorder (!%p317_p9), %s1868_s20, 0 }
  0x32   : > { %p366_p12 = scmp.eq.s32.totalorder (!%p317_p9), %s1864_s19, 0  ;;  %s1998_s9 = scalar_lea.vmem (!%p317_p9), [#allocation12], %s1520_s30 }
  0x33   : > { %s2000_s10 = scalar_lea.vmem (!%p317_p9), [#allocation13], %s1520_s30 }
  0x34   : > { %p367_p13 = pnand (!%p317_p9), %p366_p12, %p365_p11 }
  0x35   : > { %s2558_s28 = smov (!%p360_p10, %s1522_s28), 31 }
  0x36   : > { %s1523_s5 = sshll.u32 %s2558_s28, 3  ;;  %370 = sbr.rel (%p367_p13) target bundleno = 69 (0x45), region = 116 }
  0x37   : > { %s1996_s8 = scalar_lea.vmem %s2538_s1, %s1523_s5 }
  0x3b   : > { %vm371_vm0 = vcmask 0   ;;  %v1882_v16 = vmov 0.0   ;;  %v1883_v17 = vmov -inf  }
  0x3c   : > { %372 = vst.msk [vmem:[#allocation10] sm:$0x1] %vm371_vm0, %v1882_v16 }
  0x3d   : > { %375 = vst [vmem:[#allocation7] sm:$0x1] %v1882_v16 }
  0x3e   : > { %376 = vst [vmem:[#allocation7 + $0x1] sm:$0x1] %v1882_v16 }
  0x3f   : > { %379 = vst [vmem:[#allocation9] sm:$0x1] %v1882_v16 }
  0x40   : > { %380 = vst [vmem:[#allocation9 + $0x1] sm:$0x1] %v1882_v16 }
  0x41   : > { %373 = vst [vmem:[#allocation6] sm:$0x1] %v1883_v17 }
  0x42   : > { %374 = vst [vmem:[#allocation6 + $0x1] sm:$0x1] %v1883_v17 }
  0x43   : > { %377 = vst [vmem:[#allocation8] sm:$0x1] %v1883_v17 }
  0x44   : > { %378 = vst [vmem:[#allocation8 + $0x1] sm:$0x1] %v1883_v17 }
  0x45 PF: > { %p1524_p0 = scmp.ne.s32.totalorder %s1864_s19, 0 }
  0x47   : > { %383 = sbr.rel (%p1524_p0) target bundleno = 109 (0x6d), region = 120 }
  0x4c   : > { %vm384_vm1 = vcmask 7168   ;;  %v1884_v18 = vmov -inf   ;;  %v1885_v19 = vmov 0.0  }
  0x4d   : > { %385 = vst.msk [vmem:[#allocation2] sm:$0xff] %vm384_vm1, %v1884_v18 }
  0x4e   : > { %386 = vst.msk [vmem:[#allocation2 + $0x8] sm:$0xff] %vm384_vm1, %v1884_v18 }
  0x4f   : > { %387 = vst.msk [vmem:[#allocation2 + $0x10] sm:$0xff] %vm384_vm1, %v1884_v18 }
  0x50   : > { %388 = vst.msk [vmem:[#allocation2 + $0x18] sm:$0xff] %vm384_vm1, %v1884_v18 }
  0x51   : > { %389 = vst.msk [vmem:[#allocation2 + $0x20] sm:$0xff] %vm384_vm1, %v1884_v18 }
  0x52   : > { %390 = vst.msk [vmem:[#allocation2 + $0x28] sm:$0xff] %vm384_vm1, %v1884_v18 }
  0x53   : > { %391 = vst.msk [vmem:[#allocation2 + $0x30] sm:$0xff] %vm384_vm1, %v1884_v18 }
  0x54   : > { %392 = vst.msk [vmem:[#allocation2 + $0x38] sm:$0xff] %vm384_vm1, %v1884_v18 }
  0x55   : > { %401 = vst.msk [vmem:[#allocation4] sm:$0xff] %vm384_vm1, %v1884_v18 }
  0x56   : > { %402 = vst.msk [vmem:[#allocation4 + $0x8] sm:$0xff] %vm384_vm1, %v1884_v18 }
  0x57   : > { %403 = vst.msk [vmem:[#allocation4 + $0x10] sm:$0xff] %vm384_vm1, %v1884_v18 }
  0x58   : > { %404 = vst.msk [vmem:[#allocation4 + $0x18] sm:$0xff] %vm384_vm1, %v1884_v18 }
  0x59   : > { %405 = vst.msk [vmem:[#allocation4 + $0x20] sm:$0xff] %vm384_vm1, %v1884_v18 }
  0x5a   : > { %406 = vst.msk [vmem:[#allocation4 + $0x28] sm:$0xff] %vm384_vm1, %v1884_v18 }
  0x5b   : > { %407 = vst.msk [vmem:[#allocation4 + $0x30] sm:$0xff] %vm384_vm1, %v1884_v18 }
  0x5c   : > { %408 = vst.msk [vmem:[#allocation4 + $0x38] sm:$0xff] %vm384_vm1, %v1884_v18 }
  0x5d   : > { %393 = vst.msk [vmem:[#allocation3] sm:$0xff] %vm384_vm1, %v1885_v19 }
  0x5e   : > { %394 = vst.msk [vmem:[#allocation3 + $0x8] sm:$0xff] %vm384_vm1, %v1885_v19 }
  0x5f   : > { %395 = vst.msk [vmem:[#allocation3 + $0x10] sm:$0xff] %vm384_vm1, %v1885_v19 }
  0x60   : > { %396 = vst.msk [vmem:[#allocation3 + $0x18] sm:$0xff] %vm384_vm1, %v1885_v19 }
  0x61   : > { %397 = vst.msk [vmem:[#allocation3 + $0x20] sm:$0xff] %vm384_vm1, %v1885_v19 }
  0x62   : > { %398 = vst.msk [vmem:[#allocation3 + $0x28] sm:$0xff] %vm384_vm1, %v1885_v19 }
  0x63   : > { %399 = vst.msk [vmem:[#allocation3 + $0x30] sm:$0xff] %vm384_vm1, %v1885_v19 }
  0x64   : > { %400 = vst.msk [vmem:[#allocation3 + $0x38] sm:$0xff] %vm384_vm1, %v1885_v19 }
  0x65   : > { %409 = vst.msk [vmem:[#allocation5] sm:$0xff] %vm384_vm1, %v1885_v19 }
  0x66   : > { %410 = vst.msk [vmem:[#allocation5 + $0x8] sm:$0xff] %vm384_vm1, %v1885_v19 }
  0x67   : > { %411 = vst.msk [vmem:[#allocation5 + $0x10] sm:$0xff] %vm384_vm1, %v1885_v19 }
  0x68   : > { %412 = vst.msk [vmem:[#allocation5 + $0x18] sm:$0xff] %vm384_vm1, %v1885_v19 }
  0x69   : > { %413 = vst.msk [vmem:[#allocation5 + $0x20] sm:$0xff] %vm384_vm1, %v1885_v19 }
  0x6a   : > { %414 = vst.msk [vmem:[#allocation5 + $0x28] sm:$0xff] %vm384_vm1, %v1885_v19 }
  0x6b   : > { %415 = vst.msk [vmem:[#allocation5 + $0x30] sm:$0xff] %vm384_vm1, %v1885_v19 }
  0x6c   : > { %416 = vst.msk [vmem:[#allocation5 + $0x38] sm:$0xff] %vm384_vm1, %v1885_v19 }
  0x6d PF: > { %v445_v20 = vld [vmem:[%s1998_s9 + $0x38] sm:$0xff]  ;;  %v444_v21 = vld [vmem:[%s1998_s9 + $0x30] sm:$0xff]  ;;  %s2038_s17 = sshll.u32 %s1868_s20, 6  ;;  %s2041_s11 = sshll.u32 %s1864_s19, 7  ;;  %v443_v22 = vld [vmem:[%s1998_s9 + $0x28] sm:$0xff]  ;;  %vm446_vm2 = vcmask 523264  }
  0x6e   : > { %1548 = vmatpush.msra.mxu2 %v445_v20  ;;  %s424_s12 = sadd.s32 128, %s2041_s11  ;;  %s426_s13 = sadd.s32 64, %s2038_s17  ;;  %479 = vmatpush.msra.mxu0 %v445_v20  ;;  %v442_v23 = vld [vmem:[%s1998_s9 + $0x20] sm:$0xff]  ;;  %v441_v24 = vld [vmem:[%s1998_s9 + $0x18] sm:$0xff]  ;;  %v440_v25 = vld [vmem:[%s1998_s9 + $0x10] sm:$0xff] }
  0x6f   : > { %p2047_p1 = scmp.lt.s32.totalorder %s2038_s17, %s424_s12  ;;  %p2052_p2 = scmp.lt.s32.totalorder %s2041_s11, %s426_s13  ;;  %v439_v27 = vld [vmem:[%s1998_s9 + $0x8] sm:$0xff]  ;;  %v438_v29 = vld [vmem:[%s1998_s9] sm:$0xff]  ;;  %v434_v30 = vld [vmem:[%s1996_s8 + $0x20] sm:$0xff] }
  0x70   : > { %1549 = vmatpush.msra.mxu2 %v444_v21  ;;  %480 = vmatpush.msra.mxu0 %v444_v21  ;;  %s417_s16 = sld [smem:[#allocation11]]  ;;  %v430_v31 = vld [vmem:[%s1996_s8] sm:$0xff]  ;;  %v435_v33 = vld [vmem:[%s1996_s8 + $0x28] sm:$0xff]  ;;  %v436_v35 = vld [vmem:[%s1996_s8 + $0x30] sm:$0xff] }
  0x71   : > { %p428_p3 = pnand %p2052_p2, %p2047_p1  ;;  %v431_v34 = vld [vmem:[%s1996_s8 + $0x8] sm:$0xff]  ;;  %v432_v36 = vld [vmem:[%s1996_s8 + $0x10] sm:$0xff]  ;;  %v437_v37 = vld [vmem:[%s1996_s8 + $0x38] sm:$0xff] }
  0x72   : > { %1550 = vmatpush.msra.mxu2 %v443_v22  ;;  %481 = vmatpush.msra.mxu0 %v443_v22  ;;  %v433_v38 = vld [vmem:[%s1996_s8 + $0x18] sm:$0xff] }
  0x74   : > { %1551 = vmatpush.msra.mxu2 %v442_v23  ;;  %482 = vmatpush.msra.mxu0 %v442_v23 }
  0x76   : > { %1552 = vmatpush.msra.mxu2 %v441_v24  ;;  %483 = vmatpush.msra.mxu0 %v441_v24  ;;  %v418_v26 = vstv %s417_s16 }
  0x77   : > { %v419_v28 = vmul.f32 1.442695, %v418_v26 }
  0x78   : > { %1553 = vmatpush.msra.mxu2 %v440_v25  ;;  %484 = vmatpush.msra.mxu0 %v440_v25 }
  0x79   : > { %1646 = vpow2.f32 %v419_v28 }
  0x7a   : > { %1554 = vmatpush.msra.mxu2 %v439_v27  ;;  %485 = vmatpush.msra.mxu0 %v439_v27 }
  0x7c   : > { %1555 = vmatpush.msra.mxu2 %v438_v29  ;;  %486 = vmatpush.msra.mxu0 %v438_v29 }
  0x7d   : > { %1531 = vmatmul.msk.f32.vlgmr.msra.gmra.mxu2 %vm446_vm2, %v434_v30  ;;  %1527 = vmatmul.msk.f32.vlgmr.msra.gmra.mxu0 %vm446_vm2, %v430_v31 }
  0x7f   : > { %v1647_v32 = vpop.eup %1646 }
  0x80   : > { %1564 = vpush %v1647_v32 }
  0x85   : > { %1532 = vmatmul.msk.f32.gmra.mxu2 %vm446_vm2, %v435_v33  ;;  %1528 = vmatmul.msk.f32.gmra.mxu0 %vm446_vm2, %v431_v34 }
  0x8d   : > { %1533 = vmatmul.msk.f32.gmra.mxu2 %vm446_vm2, %v436_v35  ;;  %1529 = vmatmul.msk.f32.gmra.mxu0 %vm446_vm2, %v432_v36 }
  0x95   : > { %1534 = vmatmul.msk.f32.gmra.mxu2 %vm446_vm2, %v437_v37  ;;  %1530 = vmatmul.msk.f32.gmra.mxu0 %vm446_vm2, %v433_v38 }
  0xb1   : > { %s1565_s26 = spop %1564 }
  0xb2   : > { %v2081_v39 = vstv %s1565_s26 }
  0xfa   : > { %v488_v40 = vpop.f32.mrf.mxu0 }
  0xfb   : > { %v2084_v41 = vmul.f32 %v2081_v39, %v488_v40 }
 0x100   : > { %v500_v42 = vpop.f32.mrf.mxu2 }
 0x101   : > { %v2087_v43 = vmul.f32 %v2081_v39, %v500_v42 }
 0x102   : > { %v491_v44 = vpop.f32.mrf.mxu0 }
 0x103   : > { %v2090_v45 = vmul.f32 %v2081_v39, %v491_v44 }
 0x108   : > { %v503_v46 = vpop.f32.mrf.mxu2 }
 0x109   : > { %v2093_v47 = vmul.f32 %v2081_v39, %v503_v46 }
 0x10a   : > { %v494_v48 = vpop.f32.mrf.mxu0 }
 0x10b   : > { %v2096_v49 = vmul.f32 %v2081_v39, %v494_v48 }
 0x110   : > { %v506_v50 = vpop.f32.mrf.mxu2 }
 0x111   : > { %v2099_v51 = vmul.f32 %v2081_v39, %v506_v50 }
 0x112   : > { %v497_v52 = vpop.f32.mrf.mxu0 }
 0x113   : > { %v2102_v53 = vmul.f32 %v2081_v39, %v497_v52 }
 0x115   : > { %522 = sbr.rel (%p428_p3) target bundleno = 490 (0x1ea), region = 124 }
 0x118   : > { %v509_v54 = vpop.f32.mrf.mxu2 }
 0x119   : > { %v2105_v55 = vmul.f32 %v2081_v39, %v509_v54 }
 0x11a   : > { %v523_v56 = vlaneseq  ;;  %v532_v58 = vstv %s2038_s17  ;;  %v543_v63 = vstv %s2041_s11  ;;  %v577_v35 = vld [vmem:[#allocation10] sm:$0x1]  ;;  %vm581_vm11 = vcmask 0  }
 0x11c   : > { %v524_v57 = vshrl.u32 %v523_v56, 7  ;;  %v542_v59 = vand.u32 127, %v523_v56 }
 0x11e   : > { %v525_v60 = vadd.s32 8, %v524_v57  ;;  %v526_v61 = vadd.s32 16, %v524_v57  ;;  %v527_v62 = vadd.s32 24, %v524_v57  ;;  %v528_v0 = vadd.s32 32, %v524_v57 }
 0x11f   : > { %v533_v1 = vadd.s32 %v532_v58, %v524_v57  ;;  %v529_v4 = vadd.s32 40, %v524_v57  ;;  %v544_v6 = vadd.s32 %v543_v63, %v542_v59  ;;  %v530_v7 = vadd.s32 48, %v524_v57 }
 0x120   : > { %v534_v2 = vadd.s32 %v532_v58, %v525_v60  ;;  %v535_v3 = vadd.s32 %v532_v58, %v526_v61  ;;  %v536_v5 = vadd.s32 %v532_v58, %v527_v62  ;;  %v537_v8 = vadd.s32 %v532_v58, %v528_v0 }
 0x121   : > { %vm545_vm3 = vcmp.eq.s32.totalorder %v533_v1, %v544_v6  ;;  %v531_v9 = vadd.s32 56, %v524_v57  ;;  %v538_v10 = vadd.s32 %v532_v58, %v529_v4  ;;  %v539_v14 = vadd.s32 %v532_v58, %v530_v7 }
 0x122   : > { %vm546_vm4 = vcmp.eq.s32.totalorder %v534_v2, %v544_v6  ;;  %vm547_vm5 = vcmp.eq.s32.totalorder %v535_v3, %v544_v6  ;;  %vm548_vm6 = vcmp.eq.s32.totalorder %v536_v5, %v544_v6  ;;  %v553_v11 = vsel %vm545_vm3, %v2084_v41, 0.0 }
 0x123   : > { %v554_v12 = vsel %vm546_vm4, %v2090_v45, 0.0  ;;  %v555_v13 = vsel %vm547_vm5, %v2096_v49, 0.0  ;;  %vm549_vm7 = vcmp.eq.s32.totalorder %v537_v8, %v544_v6  ;;  %v556_v16 = vsel %vm548_vm6, %v2102_v53, 0.0 }
 0x124   : > { %v561_v15 = vadd.f32 %v554_v12, %v553_v11  ;;  %v540_v17 = vadd.s32 %v532_v58, %v531_v9  ;;  %vm550_vm8 = vcmp.eq.s32.totalorder %v538_v10, %v544_v6  ;;  %v557_v19 = vsel %vm549_vm7, %v2087_v43, 0.0 }
 0x125   : > { %vm551_vm9 = vcmp.eq.s32.totalorder %v539_v14, %v544_v6  ;;  %v558_v21 = vsel %vm550_vm8, %v2093_v47, 0.0 }
 0x126   : > { %v562_v18 = vadd.f32 %v561_v15, %v555_v13  ;;  %vm552_vm10 = vcmp.eq.s32.totalorder %v540_v17, %v544_v6  ;;  %v559_v23 = vsel %vm551_vm9, %v2099_v51, 0.0 }
 0x127   : > { %v560_v25 = vsel %vm552_vm10, %v2105_v55, 0.0 }
 0x128   : > { %v563_v20 = vadd.f32 %v562_v18, %v556_v16 }
 0x12a   : > { %v564_v22 = vadd.f32 %v563_v20, %v557_v19 }
 0x12c   : > { %v565_v24 = vadd.f32 %v564_v22, %v558_v21 }
 0x12e   : > { %v566_v26 = vadd.f32 %v565_v24, %v559_v23 }
 0x130   : > { %v567_v27 = vadd.f32 %v566_v26, %v560_v25 }
 0x132   : > { %568 = vadd.xlane.f32.xlu0 %v567_v27 }
 0x1a5   : > { %v569_v28 = vpop.xlane.xlu0 %568 }
 0x1a6   : > { %v570_v29 = vrot.slane %v569_v28, 4 }
 0x1a8   : > { %v571_v30 = vadd.f32 %v570_v29, %v569_v28 }
 0x1aa   : > { %v572_v31 = vrot.slane %v571_v30, 2 }
 0x1ac   : > { %v573_v32 = vadd.f32 %v572_v31, %v571_v30 }
 0x1ae   : > { %v574_v33 = vrot.slane %v573_v32, 1 }
 0x1b0   : > { %v575_v34 = vadd.f32 %v574_v33, %v573_v32 }
 0x1b2   : > { %1566 = vpush %v575_v34 }
 0x1e3   : > { %s1567_s27 = spop %1566 }
 0x1e4   : > { %s578_s28 = smul.f32 2.0, %s1567_s27 }
 0x1e6   : > { %v579_v36 = vstv %s578_s28 }
 0x1e7   : > { %v580_v37 = vsub.f32 %v577_v35, %v579_v36 }
 0x1e9   : > { %582 = vst.msk [vmem:[#allocation10] sm:$0x1] %vm581_vm11, %v580_v37 }
 0x1ea PF: > { %599 = vmax.xlane.f32.xlu2 %v2087_v43  ;;  %595 = vmax.xlane.f32.xlu1 %v2096_v49  ;;  %v1886_v38 = vmov 0   ;;  %v2133_v40 = vld [vmem:[#allocation2 + $0x20] sm:$0xff]  ;;  %v2135_v42 = vld [vmem:[#allocation2 + $0x10] sm:$0xff]  ;;  %vm743_vm12 = vcmask 7168   ;;  %v2162_v60 = vld [vmem:[#allocation2 + $0x28] sm:$0xff]  ;;  %v762_v19 = vmax.f32 %v2084_v41, %v2087_v43  ;;  %v763_v20 = vmax.f32 %v2090_v45, %v2093_v47  ;;  %s760_s30 = scalar_lea.vmem [#allocation6], %s1864_s19 }
 0x1eb   : > { %591 = vmax.xlane.f32.xlu0 %v2084_v41  ;;  %1650 = vset.pattern.permute.xlu1 %v1886_v38  ;;  %v2137_v44 = vld [vmem:[#allocation2] sm:$0xff]  ;;  %v2164_v61 = vld [vmem:[#allocation2 + $0x18] sm:$0xff]  ;;  %v2166_v62 = vld [vmem:[#allocation2 + $0x8] sm:$0xff]  ;;  %v764_v21 = vmax.f32 %v2096_v49, %v2099_v51  ;;  %v765_v22 = vmax.f32 %v2102_v53, %v2105_v55  ;;  %s803_s5 = scalar_lea.vmem [#allocation7], %s1864_s19 }
 0x1ec   : > { %1648 = vset.pattern.permute.xlu2 %v1886_v38  ;;  %1649 = vset.pattern.permute.xlu0 %v1886_v38  ;;  %v2192_v8 = vld [vmem:[#allocation2 + $0x38] sm:$0xff]  ;;  %v2194_v9 = vld [vmem:[#allocation2 + $0x30] sm:$0xff]  ;;  %v840_v16 = vld [vmem:[%s2000_s10 + $0x38] sm:$0xff]  ;;  %v766_v24 = vmax.f32 %v762_v19, %v763_v20 }
 0x1ed   : > { %1556 = vmatpush.msra.mxu3 %v840_v16  ;;  %873 = vmatpush.msra.mxu1 %v840_v16  ;;  %v839_v17 = vld [vmem:[%s2000_s10 + $0x30] sm:$0xff]  ;;  %v838_v18 = vld [vmem:[%s2000_s10 + $0x28] sm:$0xff]  ;;  %v837_v23 = vld [vmem:[%s2000_s10 + $0x20] sm:$0xff]  ;;  %v767_v25 = vmax.f32 %v764_v21, %v765_v22 }
 0x1ee   : > { %v836_v26 = vld [vmem:[%s2000_s10 + $0x18] sm:$0xff]  ;;  %v835_v28 = vld [vmem:[%s2000_s10 + $0x10] sm:$0xff]  ;;  %v834_v30 = vld [vmem:[%s2000_s10 + $0x8] sm:$0xff] }
 0x1ef   : > { %1557 = vmatpush.msra.mxu3 %v839_v17  ;;  %874 = vmatpush.msra.mxu1 %v839_v17  ;;  %v768_v27 = vmax.f32 %v766_v24, %v767_v25  ;;  %v833_v32 = vld [vmem:[%s2000_s10] sm:$0xff]  ;;  %v829_v33 = vld [vmem:[%s1996_s8 + $0x20] sm:$0xff] }
 0x1f0   : > { %v2232_v37 = vld [vmem:[%s760_s30] sm:$0x1]  ;;  %v826_v21 = vld [vmem:[%s1996_s8 + $0x8] sm:$0xff] }
 0x1f1   : > { %1558 = vmatpush.msra.mxu3 %v838_v18  ;;  %875 = vmatpush.msra.mxu1 %v838_v18  ;;  %v769_v29 = vrot.slane %v768_v27, 4 }
 0x1f2   : > { %601 = vmax.xlane.f32.xlu2 %v2093_v47  ;;  %597 = vmax.xlane.f32.xlu1 %v2102_v53 }
 0x1f3   : > { %593 = vmax.xlane.f32.xlu0 %v2090_v45  ;;  %1559 = vmatpush.msra.mxu3 %v837_v23  ;;  %v770_v31 = vmax.f32 %v768_v27, %v769_v29  ;;  %v831_v29 = vld [vmem:[%s1996_s8 + $0x30] sm:$0xff] }
 0x1f4   : > { %876 = vmatpush.msra.mxu1 %v837_v23 }
 0x1f5   : > { %1560 = vmatpush.msra.mxu3 %v836_v26  ;;  %v771_v34 = vrot.slane %v770_v31, 2 }
 0x1f6   : > { %877 = vmatpush.msra.mxu1 %v836_v26 }
 0x1f7   : > { %1561 = vmatpush.msra.mxu3 %v835_v28  ;;  %v772_v35 = vmax.f32 %v770_v31, %v771_v34  ;;  %v827_v34 = vld [vmem:[%s1996_s8 + $0x10] sm:$0xff] }
 0x1f8   : > { %878 = vmatpush.msra.mxu1 %v835_v28 }
 0x1f9   : > { %1562 = vmatpush.msra.mxu3 %v834_v30  ;;  %v773_v36 = vrot.slane %v772_v35, 1 }
 0x1fa   : > { %605 = vmax.xlane.f32.xlu1 %v2105_v55  ;;  %879 = vmatpush.msra.mxu1 %v834_v30 }
 0x1fb   : > { %603 = vmax.xlane.f32.xlu0 %v2099_v51  ;;  %1563 = vmatpush.msra.mxu3 %v833_v32 }
 0x1fc   : > { %880 = vmatpush.msra.mxu1 %v833_v32  ;;  %1539 = vmatmul.msk.f32.vlgmr.msra.gmra.mxu3 %vm446_vm2, %v829_v33 }
 0x25d   : > { %v600_v46 = vpop.xlane.xlu2 %599  ;;  %v596_v48 = vpop.xlane.xlu1 %595 }
 0x25e   : > { %v2140_v50 = vmax.f32 %v2133_v40, %v600_v46  ;;  %v2143_v52 = vmax.f32 %v2135_v42, %v596_v48  ;;  %v592_v54 = vpop.xlane.xlu0 %591  ;;  %v825_v46 = vld [vmem:[%s1996_s8] sm:$0xff]  ;;  %v774_v48 = vmax.f32 %v772_v35, %v773_v36 }
 0x25f   : > { %v2146_v56 = vmax.f32 %v2137_v44, %v592_v54  ;;  %1535 = vmatmul.msk.f32.vlgmr.msra.gmra.mxu1 %vm446_vm2, %v825_v46  ;;  %v830_v54 = vld [vmem:[%s1996_s8 + $0x28] sm:$0xff] }
 0x260   : > { %v691_v57 = vsub.f32 %v2133_v40, %v2140_v50  ;;  %756 = vst.msk [vmem:[#allocation2 + $0x20] sm:$0xff] %vm743_vm12, %v2140_v50  ;;  %v689_v58 = vsub.f32 %v2135_v42, %v2143_v52  ;;  %627 = vperm.xlu1 %1650, %v2143_v52   ;;  %1540 = vmatmul.msk.f32.gmra.mxu3 %vm446_vm2, %v830_v54 }
 0x261   : > { %754 = vst.msk [vmem:[#allocation2 + $0x10] sm:$0xff] %vm743_vm12, %v2143_v52  ;;  %v687_v59 = vsub.f32 %v2137_v44, %v2146_v56  ;;  %617 = vperm.xlu2 %1648, %v2146_v56  }
 0x262   : > { %752 = vst.msk [vmem:[#allocation2] sm:$0xff] %vm743_vm12, %v2146_v56 }
 0x265   : > { %v602_v63 = vpop.xlane.xlu2 %601  ;;  %v598_v0 = vpop.xlane.xlu1 %597 }
 0x266   : > { %v2169_v1 = vmax.f32 %v2162_v60, %v602_v63  ;;  %v2172_v2 = vmax.f32 %v2164_v61, %v598_v0  ;;  %v594_v3 = vpop.xlane.xlu0 %593  ;;  %v775_v63 = vmax.f32 %v2232_v37, %v774_v48  ;;  %v832_v48 = vld [vmem:[%s1996_s8 + $0x38] sm:$0xff] }
 0x267   : > { %v2175_v4 = vmax.f32 %v2166_v62, %v594_v3  ;;  %1536 = vmatmul.msk.f32.gmra.mxu1 %vm446_vm2, %v826_v21 }
 0x268   : > { %v692_v5 = vsub.f32 %v2162_v60, %v2169_v1  ;;  %757 = vst.msk [vmem:[#allocation2 + $0x28] sm:$0xff] %vm743_vm12, %v2169_v1  ;;  %v690_v6 = vsub.f32 %v2164_v61, %v2172_v2  ;;  %642 = vperm.xlu1 %1650, %v2169_v1   ;;  %1541 = vmatmul.msk.f32.gmra.mxu3 %vm446_vm2, %v831_v29 }
 0x269   : > { %755 = vst.msk [vmem:[#allocation2 + $0x18] sm:$0xff] %vm743_vm12, %v2172_v2  ;;  %v688_v7 = vsub.f32 %v2166_v62, %v2175_v4  ;;  %622 = vperm.xlu0 %1649, %v2175_v4   ;;  %632 = vperm.xlu2 %1648, %v2172_v2   ;;  %v686_v2 = vld [vmem:[#allocation3 + $0x38] sm:$0xff] }
 0x26a   : > { %753 = vst.msk [vmem:[#allocation2 + $0x8] sm:$0xff] %vm743_vm12, %v2175_v4  ;;  %v701_v4 = vmul.f32 1.442695, %v690_v6 }
 0x26b   : > { %824 = vst [vmem:[%s760_s30] sm:$0x1] %v775_v63  ;;  %v697_v42 = vmul.f32 1.442695, %v688_v7 }
 0x26d   : > { %v606_v10 = vpop.xlane.xlu1 %605 }
 0x26e   : > { %v2197_v11 = vmax.f32 %v2192_v8, %v606_v10  ;;  %v604_v12 = vpop.xlane.xlu0 %603  ;;  %v777_v10 = vperm.slane %v775_v63, 0 }
 0x26f   : > { %v2200_v13 = vmax.f32 %v2194_v9, %v604_v12  ;;  %1537 = vmatmul.msk.f32.gmra.mxu1 %vm446_vm2, %v827_v34 }
 0x270   : > { %v694_v14 = vsub.f32 %v2192_v8, %v2197_v11  ;;  %759 = vst.msk [vmem:[#allocation2 + $0x38] sm:$0xff] %vm743_vm12, %v2197_v11  ;;  %652 = vperm.xlu1 %1650, %v2197_v11   ;;  %v779_v16 = vsub.f32 %v2084_v41, %v777_v10  ;;  %v780_v17 = vsub.f32 %v2090_v45, %v777_v10  ;;  %v682_v11 = vld [vmem:[#allocation3 + $0x18] sm:$0xff] }
 0x271   : > { %637 = vperm.xlu2 %1648, %v2140_v50   ;;  %v693_v15 = vsub.f32 %v2194_v9, %v2200_v13  ;;  %758 = vst.msk [vmem:[#allocation2 + $0x30] sm:$0xff] %vm743_vm12, %v2200_v13  ;;  %v781_v18 = vsub.f32 %v2096_v49, %v777_v10  ;;  %v782_v19 = vsub.f32 %v2102_v53, %v777_v10 }
 0x272   : > { %v783_v20 = vsub.f32 %v2087_v43, %v777_v10  ;;  %v787_v22 = vmul.f32 1.442695, %v779_v16  ;;  %v789_v23 = vmul.f32 1.442695, %v780_v17  ;;  %v784_v24 = vsub.f32 %v2093_v47, %v777_v10  ;;  %1542 = vmatmul.msk.f32.gmra.mxu3 %vm446_vm2, %v832_v48 }
 0x273   : > { %v791_v25 = vmul.f32 1.442695, %v781_v18  ;;  %v793_v26 = vmul.f32 1.442695, %v782_v19  ;;  %v785_v27 = vsub.f32 %v2099_v51, %v777_v10  ;;  %v786_v30 = vsub.f32 %v2105_v55, %v777_v10  ;;  %v828_v18 = vld [vmem:[%s1996_s8 + $0x18] sm:$0xff] }
 0x274   : > { %v795_v28 = vmul.f32 1.442695, %v783_v20  ;;  %v797_v31 = vmul.f32 1.442695, %v784_v24  ;;  %v805_v19 = vsub.f32 %v2232_v37, %v775_v63  ;;  %v709_v62 = vmul.f32 1.442695, %v694_v14 }
 0x275   : > { %v799_v33 = vmul.f32 1.442695, %v785_v27  ;;  %v801_v46 = vmul.f32 1.442695, %v786_v30  ;;  %v707_v8 = vmul.f32 1.442695, %v693_v15 }
 0x277   : > { %1538 = vmatmul.msk.f32.gmra.mxu1 %vm446_vm2, %v828_v18 }
 0x279   : > { %647 = vperm.xlu2 %1648, %v2200_v13   ;;  %v685_v13 = vld [vmem:[#allocation3 + $0x30] sm:$0xff] }
 0x2bb   : > { %v618_v0 = vpop.permute.xlu2 %617 }
 0x2bc   : > { %v655_v3 = vsub.f32 %v2084_v41, %v618_v0 }
 0x2be   : > { %v663_v12 = vmul.f32 1.442695, %v655_v3 }
 0x2c0   : > { %1651 = vpow2.f32 %v663_v12 }
 0x2c1   : > { %1653 = vpow2.f32 %v787_v22 }
 0x2c2   : > { %1655 = vpow2.f32 %v789_v23 }
 0x2c3   : > { %v2248_v41 = vpop.permute.xlu2 %632  ;;  %1657 = vpow2.f32 %v791_v25  ;;  %v806_v25 = vmul.f32 1.442695, %v805_v19 }
 0x2c4   : > { %1659 = vpow2.f32 %v793_v26 }
 0x2c5   : > { %1661 = vpow2.f32 %v795_v28 }
 0x2c6   : > { %v1652_v32 = vpop.eup %1651  ;;  %1663 = vpow2.f32 %v797_v31 }
 0x2c7   : > { %719 = vadd.xlane.f32.xlu0 %v1652_v32  ;;  %v1654_v35 = vpop.eup %1653  ;;  %1665 = vpow2.f32 %v799_v33 }
 0x2c8   : > { %v1656_v36 = vpop.eup %1655  ;;  %1667 = vpow2.f32 %v801_v46 }
 0x2c9   : > { %v1658_v54 = vpop.eup %1657  ;;  %v809_v0 = vadd.f32 %v1656_v36, %v1654_v35 }
 0x2ca   : > { %v1660_v3 = vpop.eup %1659 }
 0x2cb   : > { %v638_v10 = vpop.permute.xlu2 %637  ;;  %v810_v12 = vadd.f32 %v1658_v54, %v809_v0  ;;  %v1662_v17 = vpop.eup %1661 }
 0x2cc   : > { %v659_v16 = vsub.f32 %v2087_v43, %v638_v10  ;;  %v1664_v22 = vpop.eup %1663 }
 0x2cd   : > { %v811_v20 = vadd.f32 %v1660_v3, %v810_v12  ;;  %v1666_v24 = vpop.eup %1665  ;;  %v658_v12 = vsub.f32 %v2102_v53, %v2248_v41 }
 0x2ce   : > { %v671_v21 = vmul.f32 1.442695, %v659_v16  ;;  %v1668_v28 = vpop.eup %1667 }
 0x2cf   : > { %v812_v23 = vadd.f32 %v1662_v17, %v811_v20  ;;  %v669_v20 = vmul.f32 1.442695, %v658_v12 }
 0x2d0   : > { %1669 = vpow2.f32 %v671_v21 }
 0x2d1   : > { %v813_v26 = vadd.f32 %v1664_v22, %v812_v23  ;;  %1671 = vpow2.f32 %v806_v25 }
 0x2d2   : > { %v628_v27 = vpop.permute.xlu1 %627 }
 0x2d3   : > { %v657_v43 = vsub.f32 %v2096_v49, %v628_v27  ;;  %v814_v29 = vadd.f32 %v1666_v24, %v813_v26  ;;  %v804_v49 = vld [vmem:[%s803_s5] sm:$0x1]  ;;  %v648_v22 = vpop.permute.xlu2 %647  ;;  %v695_v27 = vmul.f32 1.442695, %v687_v59 }
 0x2d4   : > { %v661_v53 = vsub.f32 %v2099_v51, %v648_v22 }
 0x2d5   : > { %v667_v30 = vmul.f32 1.442695, %v657_v43  ;;  %v815_v37 = vadd.f32 %v1668_v28, %v814_v29  ;;  %v894_v43 = vpop.f32.mrf.mxu3 }
 0x2d6   : > { %v1670_v31 = vpop.eup %1669  ;;  %v675_v41 = vmul.f32 1.442695, %v661_v53  ;;  %v2277_v51 = vmul.f32 %v894_v43, %v2081_v39 }
 0x2d7   : > { %1673 = vpow2.f32 %v667_v30  ;;  %727 = vadd.xlane.f32.xlu0 %v1670_v31  ;;  %v816_v63 = vrot.slane %v815_v37, 4  ;;  %v1672_v36 = vpop.eup %1671  ;;  %v679_v30 = vld [vmem:[#allocation3] sm:$0xff] }
 0x2d8   : > { %v808_v16 = vmul.f32 %v1672_v36, %v804_v49 }
 0x2d9   : > { %v817_v32 = vadd.f32 %v816_v63, %v815_v37 }
 0x2da   : > { %v643_v33 = vpop.permute.xlu1 %642 }
 0x2db   : > { %v660_v34 = vsub.f32 %v2093_v47, %v643_v33  ;;  %v623_v35 = vpop.permute.xlu0 %622  ;;  %v818_v46 = vrot.slane %v817_v32, 2  ;;  %v703_v33 = vmul.f32 1.442695, %v691_v57 }
 0x2dc   : > { %v656_v48 = vsub.f32 %v2090_v45, %v623_v35  ;;  %v882_v28 = vpop.f32.mrf.mxu1  ;;  %v699_v35 = vmul.f32 1.442695, %v689_v58  ;;  %v681_v58 = vld [vmem:[#allocation3 + $0x10] sm:$0xff] }
 0x2dd   : > { %v1674_v54 = vpop.eup %1673  ;;  %v673_v0 = vmul.f32 1.442695, %v660_v34  ;;  %v819_v3 = vadd.f32 %v818_v46, %v817_v32  ;;  %v2274_v31 = vmul.f32 %v882_v28, %v2081_v39 }
 0x2de   : > { %v665_v10 = vmul.f32 1.442695, %v656_v48  ;;  %723 = vadd.xlane.f32.xlu1 %v1674_v54  ;;  %v683_v48 = vld [vmem:[#allocation3 + $0x20] sm:$0xff] }
 0x2df   : > { %1675 = vpow2.f32 %v673_v0  ;;  %v820_v17 = vrot.slane %v819_v3, 1  ;;  %v705_v0 = vmul.f32 1.442695, %v692_v5 }
 0x2e0   : > { %1677 = vpow2.f32 %v665_v10 }
 0x2e1   : > { %v821_v47 = vadd.f32 %v820_v17, %v819_v3 }
 0x2e2   : > { %v653_v18 = vpop.permute.xlu1 %652 }
 0x2e3   : > { %v662_v19 = vsub.f32 %v2105_v55, %v653_v18  ;;  %v822_v45 = vadd.f32 %v821_v47, %v808_v16  ;;  %v897_v56 = vpop.f32.mrf.mxu3  ;;  %v684_v47 = vld [vmem:[#allocation3 + $0x28] sm:$0xff] }
 0x2e4   : > { %v885_v44 = vpop.f32.mrf.mxu1  ;;  %v2287_v34 = vmul.f32 %v897_v56, %v2081_v39 }
 0x2e5   : > { %v1676_v21 = vpop.eup %1675  ;;  %v677_v23 = vmul.f32 1.442695, %v662_v19  ;;  %823 = vst [vmem:[%s803_s5] sm:$0x1] %v822_v45  ;;  %v2284_v59 = vmul.f32 %v885_v44, %v2081_v39  ;;  %v680_v19 = vld [vmem:[#allocation3 + $0x8] sm:$0xff] }
 0x2e6   : > { %v1678_v24 = vpop.eup %1677  ;;  %729 = vadd.xlane.f32.xlu1 %v1676_v21 }
 0x2e7   : > { %1679 = vpow2.f32 %v677_v23  ;;  %721 = vadd.xlane.f32.xlu2 %v1678_v24 }
 0x2e8   : > { %1681 = vpow2.f32 %v669_v20 }
 0x2e9   : > { %1683 = vpow2.f32 %v675_v41 }
 0x2ea   : > { %1685 = vpow2.f32 %v695_v27 }
 0x2eb   : > { %1687 = vpow2.f32 %v703_v33  ;;  %v900_v50 = vpop.f32.mrf.mxu3 }
 0x2ec   : > { %v888_v36 = vpop.f32.mrf.mxu1  ;;  %1689 = vpow2.f32 %v699_v35  ;;  %v2296_v57 = vmul.f32 %v900_v50, %v2081_v39 }
 0x2ed   : > { %v1680_v25 = vpop.eup %1679  ;;  %v2293_v40 = vmul.f32 %v888_v36, %v2081_v39  ;;  %1691 = vpow2.f32 %v705_v0 }
 0x2ee   : > { %v1682_v26 = vpop.eup %1681  ;;  %733 = vadd.xlane.f32.xlu0 %v1680_v25  ;;  %1693 = vpow2.f32 %v697_v42 }
 0x2ef   : > { %725 = vadd.xlane.f32.xlu2 %v1682_v26  ;;  %v1684_v55 = vpop.eup %1683  ;;  %1695 = vpow2.f32 %v709_v62 }
 0x2f0   : > { %v1686_v29 = vpop.eup %1685  ;;  %1697 = vpow2.f32 %v701_v4 }
 0x2f1   : > { %v711_v37 = vmul.f32 %v1686_v29, %v679_v30  ;;  %v1688_v46 = vpop.eup %1687  ;;  %1699 = vpow2.f32 %v707_v8 }
 0x2f2   : > { %v715_v54 = vmul.f32 %v1688_v46, %v683_v48  ;;  %v1690_v52 = vpop.eup %1689 }
 0x2f3   : > { %v713_v17 = vmul.f32 %v1690_v52, %v681_v58  ;;  %v1692_v7 = vpop.eup %1691 }
 0x2f4   : > { %v891_v10 = vpop.f32.mrf.mxu1  ;;  %v1694_v18 = vpop.eup %1693 }
 0x2f5   : > { %v2306_v12 = vmul.f32 %v891_v10, %v2081_v39  ;;  %v903_v16 = vpop.f32.mrf.mxu3  ;;  %v712_v45 = vmul.f32 %v1694_v18, %v680_v19  ;;  %v1696_v61 = vpop.eup %1695 }
 0x2f6   : > { %v2309_v60 = vmul.f32 %v903_v16, %v2081_v39  ;;  %v716_v39 = vmul.f32 %v1692_v7, %v684_v47  ;;  %v1698_v6 = vpop.eup %1697  ;;  %v718_v14 = vmul.f32 %v1696_v61, %v686_v2 }
 0x2f7   : > { %731 = vadd.xlane.f32.xlu2 %v1684_v55  ;;  %v714_v53 = vmul.f32 %v1698_v6, %v682_v11  ;;  %v1700_v9 = vpop.eup %1699 }
 0x2f8   : > { %v717_v15 = vmul.f32 %v1700_v9, %v685_v13 }
 0x33a   : > { %v720_v63 = vpop.xlane.xlu0 %719 }
 0x33b   : > { %v735_v32 = vadd.f32 %v720_v63, %v711_v37 }
 0x33d   : > { %744 = vst.msk [vmem:[#allocation3] sm:$0xff] %vm743_vm12, %v735_v32 }
 0x34a   : > { %v728_v49 = vpop.xlane.xlu0 %727 }
 0x34b   : > { %v739_v3 = vadd.f32 %v728_v49, %v715_v54 }
 0x34d   : > { %748 = vst.msk [vmem:[#allocation3 + $0x20] sm:$0xff] %vm743_vm12, %v739_v3 }
 0x351   : > { %v724_v1 = vpop.xlane.xlu1 %723 }
 0x352   : > { %v737_v5 = vadd.f32 %v724_v1, %v713_v17 }
 0x354   : > { %746 = vst.msk [vmem:[#allocation3 + $0x10] sm:$0xff] %vm743_vm12, %v737_v5 }
 0x359   : > { %v730_v20 = vpop.xlane.xlu1 %729 }
 0x35a   : > { %v740_v21 = vadd.f32 %v730_v20, %v716_v39  ;;  %v722_v22 = vpop.xlane.xlu2 %721 }
 0x35b   : > { %v736_v23 = vadd.f32 %v722_v22, %v712_v45 }
 0x35c   : > { %749 = vst.msk [vmem:[#allocation3 + $0x28] sm:$0xff] %vm743_vm12, %v740_v21 }
 0x35d   : > { %745 = vst.msk [vmem:[#allocation3 + $0x8] sm:$0xff] %vm743_vm12, %v736_v23 }
 0x361   : > { %v734_v24 = vpop.xlane.xlu0 %733 }
 0x362   : > { %v742_v41 = vadd.f32 %v734_v24, %v718_v14  ;;  %v726_v25 = vpop.xlane.xlu2 %725 }
 0x363   : > { %v738_v26 = vadd.f32 %v726_v25, %v714_v53 }
 0x364   : > { %751 = vst.msk [vmem:[#allocation3 + $0x38] sm:$0xff] %vm743_vm12, %v742_v41 }
 0x365   : > { %747 = vst.msk [vmem:[#allocation3 + $0x18] sm:$0xff] %vm743_vm12, %v738_v26 }
 0x369   : > { %915 = sbr.rel (%p428_p3) target bundleno = 1086 (0x43e), region = 128 }
 0x36a   : > { %v732_v55 = vpop.xlane.xlu2 %731 }
 0x36b   : > { %v741_v27 = vadd.f32 %v732_v55, %v717_v15 }
 0x36d   : > { %750 = vst.msk [vmem:[#allocation3 + $0x30] sm:$0xff] %vm743_vm12, %v741_v27 }
 0x36e   : > { %v916_v28 = vlaneseq  ;;  %v925_v29 = vstv %s2038_s17  ;;  %v936_v33 = vstv %s2041_s11  ;;  %v970_v11 = vld [vmem:[#allocation10] sm:$0x1]  ;;  %vm974_vm5 = vcmask 0  }
 0x370   : > { %v917_v43 = vshrl.u32 %v916_v28, 7  ;;  %v935_v30 = vand.u32 127, %v916_v28 }
 0x372   : > { %v918_v37 = vadd.s32 8, %v917_v43  ;;  %v919_v63 = vadd.s32 16, %v917_v43  ;;  %v920_v32 = vadd.s32 24, %v917_v43  ;;  %v921_v44 = vadd.s32 32, %v917_v43 }
 0x373   : > { %v926_v56 = vadd.s32 %v925_v29, %v917_v43  ;;  %v922_v46 = vadd.s32 40, %v917_v43  ;;  %v937_v50 = vadd.s32 %v936_v33, %v935_v30  ;;  %v923_v54 = vadd.s32 48, %v917_v43 }
 0x374   : > { %v927_v35 = vadd.s32 %v925_v29, %v918_v37  ;;  %v928_v36 = vadd.s32 %v925_v29, %v919_v63  ;;  %v929_v48 = vadd.s32 %v925_v29, %v920_v32  ;;  %v930_v49 = vadd.s32 %v925_v29, %v921_v44 }
 0x375   : > { %vm938_vm13 = vcmp.eq.s32.totalorder %v926_v56, %v937_v50  ;;  %v924_v0 = vadd.s32 56, %v917_v43  ;;  %v931_v3 = vadd.s32 %v925_v29, %v922_v46  ;;  %v932_v10 = vadd.s32 %v925_v29, %v923_v54 }
 0x376   : > { %vm939_vm14 = vcmp.eq.s32.totalorder %v927_v35, %v937_v50  ;;  %vm940_vm15 = vcmp.eq.s32.totalorder %v928_v36, %v937_v50  ;;  %vm941_vm0 = vcmp.eq.s32.totalorder %v929_v48, %v937_v50  ;;  %v946_v42 = vsel %vm938_vm13, %v2274_v31, 0.0 }
 0x377   : > { %v947_v52 = vsel %vm939_vm14, %v2284_v59, 0.0  ;;  %v948_v58 = vsel %vm940_vm15, %v2293_v40, 0.0  ;;  %vm942_vm1 = vcmp.eq.s32.totalorder %v930_v49, %v937_v50  ;;  %v949_v17 = vsel %vm941_vm0, %v2306_v12, 0.0 }
 0x378   : > { %v954_v16 = vadd.f32 %v947_v52, %v946_v42  ;;  %v933_v1 = vadd.s32 %v925_v29, %v924_v0  ;;  %vm943_vm2 = vcmp.eq.s32.totalorder %v931_v3, %v937_v50  ;;  %v950_v62 = vsel %vm942_vm1, %v2277_v51, 0.0 }
 0x379   : > { %vm944_vm3 = vcmp.eq.s32.totalorder %v932_v10, %v937_v50  ;;  %v951_v7 = vsel %vm943_vm2, %v2287_v34, 0.0 }
 0x37a   : > { %v955_v5 = vadd.f32 %v954_v16, %v948_v58  ;;  %vm945_vm4 = vcmp.eq.s32.totalorder %v933_v1, %v937_v50  ;;  %v952_v18 = vsel %vm944_vm3, %v2296_v57, 0.0 }
 0x37b   : > { %v953_v39 = vsel %vm945_vm4, %v2309_v60, 0.0 }
 0x37c   : > { %v956_v4 = vadd.f32 %v955_v5, %v949_v17 }
 0x37e   : > { %v957_v47 = vadd.f32 %v956_v4, %v950_v62 }
 0x380   : > { %v958_v19 = vadd.f32 %v957_v47, %v951_v7 }
 0x382   : > { %v959_v20 = vadd.f32 %v958_v19, %v952_v18 }
 0x384   : > { %v960_v45 = vadd.f32 %v959_v20, %v953_v39 }
 0x386   : > { %961 = vadd.xlane.f32.xlu0 %v960_v45 }
 0x3f9   : > { %v962_v21 = vpop.xlane.xlu0 %961 }
 0x3fa   : > { %v963_v22 = vrot.slane %v962_v21, 4 }
 0x3fc   : > { %v964_v23 = vadd.f32 %v963_v22, %v962_v21 }
 0x3fe   : > { %v965_v8 = vrot.slane %v964_v23, 2 }
 0x400   : > { %v966_v61 = vadd.f32 %v965_v8, %v964_v23 }
 0x402   : > { %v967_v2 = vrot.slane %v966_v61, 1 }
 0x404   : > { %v968_v6 = vadd.f32 %v967_v2, %v966_v61 }
 0x406   : > { %1568 = vpush %v968_v6 }
 0x437   : > { %s1569_s6 = spop %1568 }
 0x438   : > { %s971_s7 = smul.f32 2.0, %s1569_s6 }
 0x43a   : > { %v972_v14 = vstv %s971_s7 }
 0x43b   : > { %v973_v24 = vsub.f32 %v970_v11, %v972_v14 }
 0x43d   : > { %975 = vst.msk [vmem:[#allocation10] sm:$0x1] %vm974_vm5, %v973_v24 }
 0x43e PF: > { %992 = vmax.xlane.f32.xlu2 %v2277_v51  ;;  %988 = vmax.xlane.f32.xlu1 %v2293_v40  ;;  %v2352_v53 = vld [vmem:[#allocation4 + $0x20] sm:$0xff]  ;;  %v2354_v41 = vld [vmem:[#allocation4 + $0x10] sm:$0xff]  ;;  %v2381_v29 = vld [vmem:[#allocation4 + $0x28] sm:$0xff]  ;;  %p1217_p4 = scmp.eq.s32.totalorder %s1864_s19, 1  ;;  %s1152_s8 = scalar_lea.vmem [#allocation8], %s1864_s19 }
 0x43f   : > { %984 = vmax.xlane.f32.xlu0 %v2274_v31  ;;  %1703 = vset.pattern.permute.xlu1 %v1886_v38  ;;  %v2356_v25 = vld [vmem:[#allocation4] sm:$0xff]  ;;  %v2383_v30 = vld [vmem:[#allocation4 + $0x18] sm:$0xff]  ;;  %v2385_v37 = vld [vmem:[#allocation4 + $0x8] sm:$0xff]  ;;  %s1195_s9 = scalar_lea.vmem [#allocation9], %s1864_s19  ;;  %p1543_p5 = scmp.ne.s32.totalorder %s1864_s19, 1 }
 0x440   : > { %1701 = vset.pattern.permute.xlu2 %v1886_v38  ;;  %1702 = vset.pattern.permute.xlu0 %v1886_v38  ;;  %v2411_v50 = vld [vmem:[#allocation4 + $0x38] sm:$0xff]  ;;  %v2413_v54 = vld [vmem:[#allocation4 + $0x30] sm:$0xff] }
 0x446   : > { %994 = vmax.xlane.f32.xlu2 %v2287_v34  ;;  %990 = vmax.xlane.f32.xlu1 %v2306_v12 }
 0x447   : > { %986 = vmax.xlane.f32.xlu0 %v2284_v59 }
 0x44e   : > { %998 = vmax.xlane.f32.xlu1 %v2309_v60 }
 0x44f   : > { %996 = vmax.xlane.f32.xlu0 %v2296_v57 }
 0x4b1   : > { %v993_v26 = vpop.xlane.xlu2 %992  ;;  %v989_v9 = vpop.xlane.xlu1 %988 }
 0x4b2   : > { %v2359_v38 = vmax.f32 %v2352_v53, %v993_v26  ;;  %v2362_v13 = vmax.f32 %v2354_v41, %v989_v9  ;;  %v985_v15 = vpop.xlane.xlu0 %984 }
 0x4b3   : > { %v2365_v55 = vmax.f32 %v2356_v25, %v985_v15 }
 0x4b4   : > { %v1084_v27 = vsub.f32 %v2352_v53, %v2359_v38  ;;  %1148 = vst.msk [vmem:[#allocation4 + $0x20] sm:$0xff] %vm743_vm12, %v2359_v38  ;;  %v1082_v28 = vsub.f32 %v2354_v41, %v2362_v13  ;;  %1020 = vperm.xlu1 %1703, %v2362_v13   ;;  %v1076_v53 = vld [vmem:[#allocation5 + $0x20] sm:$0xff] }
 0x4b5   : > { %1146 = vst.msk [vmem:[#allocation4 + $0x10] sm:$0xff] %vm743_vm12, %v2362_v13  ;;  %v1080_v43 = vsub.f32 %v2356_v25, %v2365_v55  ;;  %1010 = vperm.xlu2 %1701, %v2365_v55  }
 0x4b6   : > { %1144 = vst.msk [vmem:[#allocation4] sm:$0xff] %vm743_vm12, %v2365_v55 }
 0x4b9   : > { %v995_v63 = vpop.xlane.xlu2 %994  ;;  %v991_v32 = vpop.xlane.xlu1 %990 }
 0x4ba   : > { %v2388_v33 = vmax.f32 %v2381_v29, %v995_v63  ;;  %v2391_v44 = vmax.f32 %v2383_v30, %v991_v32  ;;  %v987_v56 = vpop.xlane.xlu0 %986 }
 0x4bb   : > { %v2394_v35 = vmax.f32 %v2385_v37, %v987_v56 }
 0x4bc   : > { %v1085_v36 = vsub.f32 %v2381_v29, %v2388_v33  ;;  %1149 = vst.msk [vmem:[#allocation4 + $0x28] sm:$0xff] %vm743_vm12, %v2388_v33  ;;  %v1083_v46 = vsub.f32 %v2383_v30, %v2391_v44  ;;  %1035 = vperm.xlu1 %1703, %v2388_v33  }
 0x4bd   : > { %1147 = vst.msk [vmem:[#allocation4 + $0x18] sm:$0xff] %vm743_vm12, %v2391_v44  ;;  %v1081_v48 = vsub.f32 %v2385_v37, %v2394_v35  ;;  %1015 = vperm.xlu0 %1702, %v2394_v35   ;;  %1025 = vperm.xlu2 %1701, %v2391_v44   ;;  %v1079_v44 = vld [vmem:[#allocation5 + $0x38] sm:$0xff] }
 0x4be   : > { %1145 = vst.msk [vmem:[#allocation4 + $0x8] sm:$0xff] %vm743_vm12, %v2394_v35  ;;  %v1094_v37 = vmul.f32 1.442695, %v1083_v46  ;;  %v1077_v35 = vld [vmem:[#allocation5 + $0x28] sm:$0xff] }
 0x4c1   : > { %v999_v49 = vpop.xlane.xlu1 %998 }
 0x4c2   : > { %v2416_v0 = vmax.f32 %v2411_v50, %v999_v49  ;;  %v997_v3 = vpop.xlane.xlu0 %996 }
 0x4c3   : > { %v2419_v42 = vmax.f32 %v2413_v54, %v997_v3 }
 0x4c4   : > { %v1087_v52 = vsub.f32 %v2411_v50, %v2416_v0  ;;  %1151 = vst.msk [vmem:[#allocation4 + $0x38] sm:$0xff] %vm743_vm12, %v2416_v0  ;;  %1045 = vperm.xlu1 %1703, %v2416_v0   ;;  %v1075_v0 = vld [vmem:[#allocation5 + $0x18] sm:$0xff] }
 0x4c5   : > { %1030 = vperm.xlu2 %1701, %v2359_v38   ;;  %v1086_v58 = vsub.f32 %v2413_v54, %v2419_v42  ;;  %1150 = vst.msk [vmem:[#allocation4 + $0x30] sm:$0xff] %vm743_vm12, %v2419_v42 }
 0x4c6   : > { %v1102_v29 = vmul.f32 1.442695, %v1087_v52 }
 0x4c7   : > { %v1100_v50 = vmul.f32 1.442695, %v1086_v58 }
 0x4cd   : > { %1040 = vperm.xlu2 %1701, %v2419_v42   ;;  %v1078_v42 = vld [vmem:[#allocation5 + $0x30] sm:$0xff] }
 0x50f   : > { %v1011_v10 = vpop.permute.xlu2 %1010 }
 0x510   : > { %v1048_v16 = vsub.f32 %v2274_v31, %v1011_v10  ;;  %v1154_v10 = vmax.f32 %v2274_v31, %v2277_v51 }
 0x512   : > { %v1056_v17 = vmul.f32 1.442695, %v1048_v16  ;;  %v1155_v16 = vmax.f32 %v2284_v59, %v2287_v34 }
 0x514   : > { %1704 = vpow2.f32 %v1056_v17  ;;  %v1156_v17 = vmax.f32 %v2293_v40, %v2296_v57 }
 0x517   : > { %v1026_v1 = vpop.permute.xlu2 %1025 }
 0x518   : > { %v1051_v2 = vsub.f32 %v2306_v12, %v1026_v1  ;;  %v1157_v1 = vmax.f32 %v2306_v12, %v2309_v60 }
 0x51a   : > { %v1705_v5 = vpop.eup %1704  ;;  %v1062_v14 = vmul.f32 1.442695, %v1051_v2 }
 0x51b   : > { %1112 = vadd.xlane.f32.xlu0 %v1705_v5  ;;  %v1158_v5 = vmax.f32 %v1154_v10, %v1155_v16 }
 0x51f   : > { %v1031_v62 = vpop.permute.xlu2 %1030 }
 0x520   : > { %v1052_v4 = vsub.f32 %v2277_v51, %v1031_v62  ;;  %v1159_v62 = vmax.f32 %v1156_v17, %v1157_v1 }
 0x522   : > { %v1064_v7 = vmul.f32 1.442695, %v1052_v4  ;;  %v1160_v4 = vmax.f32 %v1158_v5, %v1159_v62 }
 0x524   : > { %1706 = vpow2.f32 %v1064_v7  ;;  %v1161_v7 = vrot.slane %v1160_v4, 4 }
 0x526   : > { %v1021_v47 = vpop.permute.xlu1 %1020 }
 0x527   : > { %v1050_v18 = vsub.f32 %v2293_v40, %v1021_v47  ;;  %v1041_v26 = vpop.permute.xlu2 %1040  ;;  %v1162_v47 = vmax.f32 %v1160_v4, %v1161_v7 }
 0x528   : > { %v1054_v63 = vsub.f32 %v2296_v57, %v1041_v26 }
 0x529   : > { %v1060_v19 = vmul.f32 1.442695, %v1050_v18  ;;  %v1163_v18 = vrot.slane %v1162_v47, 2 }
 0x52a   : > { %v1707_v39 = vpop.eup %1706  ;;  %v1068_v32 = vmul.f32 1.442695, %v1054_v63 }
 0x52b   : > { %1708 = vpow2.f32 %v1060_v19  ;;  %1120 = vadd.xlane.f32.xlu0 %v1707_v39  ;;  %v1164_v19 = vmax.f32 %v1162_v47, %v1163_v18 }
 0x52d   : > { %v1165_v39 = vrot.slane %v1164_v19, 1 }
 0x52e   : > { %v1036_v20 = vpop.permute.xlu1 %1035 }
 0x52f   : > { %v1053_v45 = vsub.f32 %v2287_v34, %v1036_v20  ;;  %v1016_v21 = vpop.permute.xlu0 %1015  ;;  %v1166_v20 = vmax.f32 %v1164_v19, %v1165_v39 }
 0x530   : > { %v1049_v22 = vsub.f32 %v2284_v59, %v1016_v21 }
 0x531   : > { %v1709_v23 = vpop.eup %1708  ;;  %v1066_v8 = vmul.f32 1.442695, %v1053_v45  ;;  %v1153_v45 = vld [vmem:[%s1152_s8] sm:$0x1] }
 0x532   : > { %v1058_v61 = vmul.f32 1.442695, %v1049_v22  ;;  %1116 = vadd.xlane.f32.xlu1 %v1709_v23  ;;  %v1167_v21 = vmax.f32 %v1153_v45, %v1166_v20 }
 0x533   : > { %1710 = vpow2.f32 %v1066_v8 }
 0x534   : > { %1712 = vpow2.f32 %v1058_v61  ;;  %v1169_v22 = vperm.slane %v1167_v21, 0  ;;  %1216 = vst [vmem:[%s1152_s8] sm:$0x1] %v1167_v21  ;;  %v1197_v19 = vsub.f32 %v1153_v45, %v1167_v21 }
 0x536   : > { %v1046_v6 = vpop.permute.xlu1 %1045  ;;  %v1171_v23 = vsub.f32 %v2274_v31, %v1169_v22  ;;  %v1172_v8 = vsub.f32 %v2284_v59, %v1169_v22  ;;  %v1173_v61 = vsub.f32 %v2293_v40, %v1169_v22  ;;  %v1175_v26 = vsub.f32 %v2277_v51, %v1169_v22 }
 0x537   : > { %v1055_v11 = vsub.f32 %v2309_v60, %v1046_v6  ;;  %v1176_v31 = vsub.f32 %v2287_v34, %v1169_v22  ;;  %v1178_v25 = vsub.f32 %v2309_v60, %v1169_v22  ;;  %v1096_v60 = vmul.f32 1.442695, %v1084_v27 }
 0x538   : > { %v1179_v2 = vmul.f32 1.442695, %v1171_v23  ;;  %v1181_v6 = vmul.f32 1.442695, %v1172_v8  ;;  %v1187_v59 = vmul.f32 1.442695, %v1175_v26 }
 0x539   : > { %v1711_v24 = vpop.eup %1710  ;;  %v1070_v9 = vmul.f32 1.442695, %v1055_v11  ;;  %v1174_v11 = vsub.f32 %v2306_v12, %v1169_v22  ;;  %v1189_v12 = vmul.f32 1.442695, %v1176_v31  ;;  %v1198_v20 = vmul.f32 1.442695, %v1197_v19 }
 0x53a   : > { %v1713_v15 = vpop.eup %1712  ;;  %1122 = vadd.xlane.f32.xlu1 %v1711_v24  ;;  %v1088_v24 = vmul.f32 1.442695, %v1080_v43  ;;  %v1092_v23 = vmul.f32 1.442695, %v1082_v28  ;;  %v1090_v28 = vmul.f32 1.442695, %v1081_v48 }
 0x53b   : > { %1714 = vpow2.f32 %v1070_v9  ;;  %1114 = vadd.xlane.f32.xlu2 %v1713_v15  ;;  %v1185_v9 = vmul.f32 1.442695, %v1174_v11  ;;  %v1177_v15 = vsub.f32 %v2296_v57, %v1169_v22  ;;  %v1196_v11 = vld [vmem:[%s1195_s9] sm:$0x1]  ;;  %v1073_v48 = vld [vmem:[#allocation5 + $0x8] sm:$0xff] }
 0x53c   : > { %1716 = vpow2.f32 %v1062_v14  ;;  %v1183_v14 = vmul.f32 1.442695, %v1173_v61 }
 0x53d   : > { %1718 = vpow2.f32 %v1068_v32  ;;  %v1191_v55 = vmul.f32 1.442695, %v1177_v15 }
 0x53e   : > { %1720 = vpow2.f32 %v1179_v2 }
 0x53f   : > { %1722 = vpow2.f32 %v1181_v6 }
 0x540   : > { %1724 = vpow2.f32 %v1183_v14 }
 0x541   : > { %v1715_v56 = vpop.eup %1714  ;;  %1726 = vpow2.f32 %v1185_v9  ;;  %v1074_v9 = vld [vmem:[#allocation5 + $0x10] sm:$0xff] }
 0x542   : > { %v1717_v49 = vpop.eup %1716  ;;  %1126 = vadd.xlane.f32.xlu0 %v1715_v56  ;;  %1728 = vpow2.f32 %v1088_v24  ;;  %v1193_v56 = vmul.f32 1.442695, %v1178_v25  ;;  %v1098_v24 = vmul.f32 1.442695, %v1085_v36 }
 0x543   : > { %1118 = vadd.xlane.f32.xlu2 %v1717_v49  ;;  %v1719_v3 = vpop.eup %1718  ;;  %1730 = vpow2.f32 %v1187_v59 }
 0x544   : > { %v1721_v40 = vpop.eup %1720  ;;  %1732 = vpow2.f32 %v1189_v12 }
 0x545   : > { %v1723_v63 = vpop.eup %1722  ;;  %1734 = vpow2.f32 %v1191_v55 }
 0x546   : > { %v1725_v32 = vpop.eup %1724  ;;  %v1201_v43 = vadd.f32 %v1723_v63, %v1721_v40  ;;  %1736 = vpow2.f32 %v1193_v56 }
 0x547   : > { %v1727_v51 = vpop.eup %1726  ;;  %1738 = vpow2.f32 %v1096_v60 }
 0x548   : > { %v1202_v49 = vadd.f32 %v1725_v32, %v1201_v43  ;;  %v1729_v34 = vpop.eup %1728  ;;  %1740 = vpow2.f32 %v1198_v20 }
 0x549   : > { %v1731_v10 = vpop.eup %1730  ;;  %1742 = vpow2.f32 %v1092_v23 }
 0x54a   : > { %v1203_v16 = vadd.f32 %v1727_v51, %v1202_v49  ;;  %v1733_v17 = vpop.eup %1732  ;;  %1744 = vpow2.f32 %v1098_v24 }
 0x54b   : > { %1124 = vadd.xlane.f32.xlu2 %v1719_v3  ;;  %v1072_v3 = vld [vmem:[#allocation5] sm:$0xff]  ;;  %v1735_v62 = vpop.eup %1734  ;;  %1746 = vpow2.f32 %v1090_v28 }
 0x54c   : > { %v1104_v57 = vmul.f32 %v1729_v34, %v1072_v3  ;;  %v1204_v1 = vadd.f32 %v1731_v10, %v1203_v16  ;;  %v1737_v47 = vpop.eup %1736  ;;  %1748 = vpow2.f32 %v1102_v29 }
 0x54d   : > { %v1739_v2 = vpop.eup %1738  ;;  %1750 = vpow2.f32 %v1094_v37 }
 0x54e   : > { %v1205_v7 = vadd.f32 %v1733_v17, %v1204_v1  ;;  %v1741_v27 = vpop.eup %1740  ;;  %v1108_v6 = vmul.f32 %v1739_v2, %v1076_v53  ;;  %1752 = vpow2.f32 %v1100_v50 }
 0x54f   : > { %v1200_v14 = vmul.f32 %v1741_v27, %v1196_v11  ;;  %v1743_v26 = vpop.eup %1742 }
 0x550   : > { %v1206_v18 = vadd.f32 %v1735_v62, %v1205_v7  ;;  %v1106_v59 = vmul.f32 %v1743_v26, %v1074_v9  ;;  %v1745_v33 = vpop.eup %1744 }
 0x551   : > { %v1747_v36 = vpop.eup %1746  ;;  %v1109_v12 = vmul.f32 %v1745_v33, %v1077_v35 }
 0x552   : > { %v1207_v39 = vadd.f32 %v1737_v47, %v1206_v18  ;;  %v1105_v32 = vmul.f32 %v1747_v36, %v1073_v48  ;;  %v1749_v30 = vpop.eup %1748 }
 0x553   : > { %v1751_v46 = vpop.eup %1750  ;;  %v1111_v52 = vmul.f32 %v1749_v30, %v1079_v44 }
 0x554   : > { %v1208_v22 = vrot.slane %v1207_v39, 4  ;;  %v1107_v56 = vmul.f32 %v1751_v46, %v1075_v0  ;;  %v1753_v54 = vpop.eup %1752 }
 0x555   : > { %v1110_v58 = vmul.f32 %v1753_v54, %v1078_v42 }
 0x556   : > { %v1209_v8 = vadd.f32 %v1208_v22, %v1207_v39 }
 0x558   : > { %v1210_v61 = vrot.slane %v1209_v8, 2 }
 0x55a   : > { %v1211_v38 = vadd.f32 %v1210_v61, %v1209_v8 }
 0x55c   : > { %v1212_v45 = vrot.slane %v1211_v38, 1 }
 0x55e   : > { %v1213_v13 = vadd.f32 %v1212_v45, %v1211_v38 }
 0x560   : > { %v1214_v31 = vadd.f32 %v1213_v13, %v1200_v14 }
 0x562   : > { %1215 = vst [vmem:[%s1195_s9] sm:$0x1] %v1214_v31 }
 0x58e   : > { %v1113_v5 = vpop.xlane.xlu0 %1112 }
 0x58f   : > { %v1128_v4 = vadd.f32 %v1113_v5, %v1104_v57 }
 0x591   : > { %1136 = vst.msk [vmem:[#allocation5] sm:$0xff] %vm743_vm12, %v1128_v4 }
 0x59e   : > { %v1121_v21 = vpop.xlane.xlu0 %1120 }
 0x59f   : > { %v1132_v41 = vadd.f32 %v1121_v21, %v1108_v6 }
 0x5a1   : > { %1140 = vst.msk [vmem:[#allocation5 + $0x20] sm:$0xff] %vm743_vm12, %v1132_v41 }
 0x5a5   : > { %v1117_v40 = vpop.xlane.xlu1 %1116 }
 0x5a6   : > { %v1130_v15 = vadd.f32 %v1117_v40, %v1106_v59 }
 0x5a8   : > { %1138 = vst.msk [vmem:[#allocation5 + $0x10] sm:$0xff] %vm743_vm12, %v1130_v15 }
 0x5ad   : > { %v1123_v63 = vpop.xlane.xlu1 %1122 }
 0x5ae   : > { %v1133_v25 = vadd.f32 %v1123_v63, %v1109_v12  ;;  %v1115_v55 = vpop.xlane.xlu2 %1114 }
 0x5af   : > { %v1129_v43 = vadd.f32 %v1115_v55, %v1105_v32 }
 0x5b0   : > { %1141 = vst.msk [vmem:[#allocation5 + $0x28] sm:$0xff] %vm743_vm12, %v1133_v25 }
 0x5b1   : > { %1137 = vst.msk [vmem:[#allocation5 + $0x8] sm:$0xff] %vm743_vm12, %v1129_v43 }
 0x5b5   : > { %v1127_v51 = vpop.xlane.xlu0 %1126 }
 0x5b6   : > { %v1135_v49 = vadd.f32 %v1127_v51, %v1111_v52  ;;  %v1119_v34 = vpop.xlane.xlu2 %1118 }
 0x5b7   : > { %v1131_v3 = vadd.f32 %v1119_v34, %v1107_v56 }
 0x5b8   : > { %1143 = vst.msk [vmem:[#allocation5 + $0x38] sm:$0xff] %vm743_vm12, %v1135_v49 }
 0x5b9   : > { %1139 = vst.msk [vmem:[#allocation5 + $0x18] sm:$0xff] %vm743_vm12, %v1131_v3 }
 0x5bd   : > { %1220 = sbr.rel (%p1543_p5) target bundleno = 1694 (0x69e), region = 132 }
 0x5be   : > { %v1125_v10 = vpop.xlane.xlu2 %1124 }
 0x5bf   : > { %v1134_v16 = vadd.f32 %v1125_v10, %v1110_v58 }
 0x5c1   : > { %1142 = vst.msk [vmem:[#allocation5 + $0x30] sm:$0xff] %vm743_vm12, %v1134_v16 }
 0x5c2   : > { %v1229_v17 = vld [vmem:[#allocation3] sm:$0xff]  ;;  %v1230_v57 = vld [vmem:[#allocation3 + $0x8] sm:$0xff]  ;;  %v1231_v1 = vld [vmem:[#allocation3 + $0x10] sm:$0xff]  ;;  %vm1353_vm6 = vcmask 0  }
 0x5c3   : > { %v1232_v5 = vld [vmem:[#allocation3 + $0x18] sm:$0xff]  ;;  %1754 = vlog2.f32 %v1229_v17  ;;  %v1233_v62 = vld [vmem:[#allocation3 + $0x20] sm:$0xff]  ;;  %v1234_v4 = vld [vmem:[#allocation3 + $0x28] sm:$0xff] }
 0x5c4   : > { %1756 = vlog2.f32 %v1230_v57  ;;  %v1235_v7 = vld [vmem:[#allocation3 + $0x30] sm:$0xff]  ;;  %v1236_v60 = vld [vmem:[#allocation3 + $0x38] sm:$0xff]  ;;  %v1293_v47 = vld [vmem:[#allocation5] sm:$0xff] }
 0x5c5   : > { %1758 = vlog2.f32 %v1231_v1  ;;  %v1221_v19 = vld [vmem:[#allocation2] sm:$0xff]  ;;  %v1294_v39 = vld [vmem:[#allocation5 + $0x8] sm:$0xff]  ;;  %v1295_v8 = vld [vmem:[#allocation5 + $0x10] sm:$0xff] }
 0x5c6   : > { %1760 = vlog2.f32 %v1232_v5  ;;  %v1222_v22 = vld [vmem:[#allocation2 + $0x8] sm:$0xff]  ;;  %v1223_v2 = vld [vmem:[#allocation2 + $0x10] sm:$0xff]  ;;  %v1296_v38 = vld [vmem:[#allocation5 + $0x18] sm:$0xff] }
 0x5c7   : > { %1762 = vlog2.f32 %v1233_v62  ;;  %v1224_v6 = vld [vmem:[#allocation2 + $0x18] sm:$0xff]  ;;  %v1297_v21 = vld [vmem:[#allocation5 + $0x20] sm:$0xff]  ;;  %v1226_v26 = vld [vmem:[#allocation2 + $0x28] sm:$0xff] }
 0x5c8   : > { %1764 = vlog2.f32 %v1234_v4  ;;  %v1225_v24 = vld [vmem:[#allocation2 + $0x20] sm:$0xff]  ;;  %v1298_v40 = vld [vmem:[#allocation5 + $0x28] sm:$0xff]  ;;  %v1227_v36 = vld [vmem:[#allocation2 + $0x30] sm:$0xff] }
 0x5c9   : > { %v1755_v18 = vpop.eup %1754  ;;  %1766 = vlog2.f32 %v1235_v7  ;;  %v1299_v25 = vld [vmem:[#allocation5 + $0x30] sm:$0xff]  ;;  %v1228_v43 = vld [vmem:[#allocation2 + $0x38] sm:$0xff]  ;;  %v1285_v51 = vld [vmem:[#allocation4] sm:$0xff] }
 0x5ca   : > { %v1757_v20 = vpop.eup %1756  ;;  %v1238_v23 = vmul.f32 0.6931472, %v1755_v18  ;;  %1768 = vlog2.f32 %v1236_v60  ;;  %v1300_v46 = vld [vmem:[#allocation5 + $0x38] sm:$0xff]  ;;  %v1286_v56 = vld [vmem:[#allocation4 + $0x8] sm:$0xff]  ;;  %v1287_v42 = vld [vmem:[#allocation4 + $0x10] sm:$0xff] }
 0x5cb   : > { %v1759_v61 = vpop.eup %1758  ;;  %v1240_v53 = vmul.f32 0.6931472, %v1757_v20  ;;  %1770 = vlog2.f32 %v1293_v47  ;;  %v1288_v57 = vld [vmem:[#allocation4 + $0x18] sm:$0xff]  ;;  %v1289_v4 = vld [vmem:[#allocation4 + $0x20] sm:$0xff] }
 0x5cc   : > { %v1761_v27 = vpop.eup %1760  ;;  %v1242_v11 = vmul.f32 0.6931472, %v1759_v61  ;;  %v1253_v45 = vadd.f32 %v1238_v23, %v1221_v19  ;;  %1772 = vlog2.f32 %v1294_v39  ;;  %v1290_v23 = vld [vmem:[#allocation4 + $0x28] sm:$0xff] }
 0x5cd   : > { %v1763_v14 = vpop.eup %1762  ;;  %v1244_v41 = vmul.f32 0.6931472, %v1761_v27  ;;  %v1254_v13 = vadd.f32 %v1240_v53, %v1222_v22  ;;  %1774 = vlog2.f32 %v1295_v8 }
 0x5ce   : > { %v1765_v28 = vpop.eup %1764  ;;  %v1246_v9 = vmul.f32 0.6931472, %v1763_v14  ;;  %v1255_v31 = vadd.f32 %v1242_v11, %v1223_v2  ;;  %v1261_v59 = vsel %vm743_vm12, %v1253_v45, 0.0  ;;  %1776 = vlog2.f32 %v1296_v38 }
 0x5cf   : > { %v1767_v15 = vpop.eup %1766  ;;  %v1248_v29 = vmul.f32 0.6931472, %v1765_v28  ;;  %v1256_v37 = vadd.f32 %v1244_v41, %v1224_v6  ;;  %v1262_v33 = vsel %vm743_vm12, %v1254_v13, 0.0  ;;  %1778 = vlog2.f32 %v1297_v21  ;;  %v1291_v21 = vld [vmem:[#allocation4 + $0x30] sm:$0xff]  ;;  %v1292_v28 = vld [vmem:[#allocation4 + $0x38] sm:$0xff] }
 0x5d0   : > { %v1769_v35 = vpop.eup %1768  ;;  %v1250_v48 = vmul.f32 0.6931472, %v1767_v15  ;;  %v1257_v12 = vadd.f32 %v1246_v9, %v1225_v24  ;;  %v1263_v63 = vadd.f32 %v1262_v33, %v1261_v59  ;;  %v1264_v32 = vsel %vm743_vm12, %v1255_v31, 0.0 }
 0x5d1   : > { %v1771_v55 = vpop.eup %1770  ;;  %v1252_v50 = vmul.f32 0.6931472, %v1769_v35  ;;  %v1258_v30 = vadd.f32 %v1248_v29, %v1226_v26  ;;  %v1266_v44 = vsel %vm743_vm12, %v1256_v37, 0.0  ;;  %1780 = vlog2.f32 %v1298_v40 }
 0x5d2   : > { %v1773_v0 = vpop.eup %1772  ;;  %v1265_v52 = vadd.f32 %v1264_v32, %v1263_v63  ;;  %v1302_v49 = vmul.f32 0.6931472, %v1771_v55  ;;  %v1259_v3 = vadd.f32 %v1250_v48, %v1227_v36  ;;  %v1268_v54 = vsel %vm743_vm12, %v1257_v12, 0.0 }
 0x5d3   : > { %v1775_v34 = vpop.eup %1774  ;;  %v1304_v58 = vmul.f32 0.6931472, %v1773_v0  ;;  %1782 = vlog2.f32 %v1299_v25  ;;  %v1260_v16 = vadd.f32 %v1252_v50, %v1228_v43  ;;  %v1270_v62 = vsel %vm743_vm12, %v1258_v30, 0.0 }
 0x5d4   : > { %v1777_v10 = vpop.eup %1776  ;;  %v1267_v17 = vadd.f32 %v1266_v44, %v1265_v52  ;;  %v1306_v1 = vmul.f32 0.6931472, %v1775_v34  ;;  %1784 = vlog2.f32 %v1300_v46  ;;  %v1317_v60 = vadd.f32 %v1302_v49, %v1285_v51 }
 0x5d5   : > { %v1779_v5 = vpop.eup %1778  ;;  %v1308_v7 = vmul.f32 0.6931472, %v1777_v10  ;;  %v1318_v47 = vadd.f32 %v1304_v58, %v1286_v56  ;;  %v1272_v22 = vsel %vm743_vm12, %v1259_v3, 0.0  ;;  %v1274_v45 = vsel %vm743_vm12, %v1260_v16, 0.0 }
 0x5d6   : > { %v1269_v18 = vadd.f32 %v1268_v54, %v1267_v17  ;;  %v1310_v19 = vmul.f32 0.6931472, %v1779_v5  ;;  %v1319_v39 = vadd.f32 %v1306_v1, %v1287_v42  ;;  %v1325_v61 = vsel %vm743_vm12, %v1317_v60, 0.0  ;;  %v1350_v42 = vld [vmem:[#allocation10] sm:$0x1] }
 0x5d7   : > { %v1781_v20 = vpop.eup %1780  ;;  %v1320_v8 = vadd.f32 %v1308_v7, %v1288_v57  ;;  %v1326_v2 = vsel %vm743_vm12, %v1318_v47, 0.0 }
 0x5d8   : > { %v1271_v53 = vadd.f32 %v1270_v62, %v1269_v18  ;;  %v1312_v38 = vmul.f32 0.6931472, %v1781_v20  ;;  %v1321_v27 = vadd.f32 %v1310_v19, %v1289_v4  ;;  %v1327_v6 = vadd.f32 %v1326_v2, %v1325_v61 }
 0x5d9   : > { %v1783_v11 = vpop.eup %1782  ;;  %v1328_v14 = vsel %vm743_vm12, %v1319_v39, 0.0  ;;  %v1330_v24 = vsel %vm743_vm12, %v1320_v8, 0.0 }
 0x5da   : > { %v1785_v41 = vpop.eup %1784  ;;  %v1273_v13 = vadd.f32 %v1272_v22, %v1271_v53  ;;  %v1314_v26 = vmul.f32 0.6931472, %v1783_v11  ;;  %v1322_v9 = vadd.f32 %v1312_v38, %v1290_v23  ;;  %v1329_v31 = vadd.f32 %v1328_v14, %v1327_v6 }
 0x5db   : > { %v1316_v59 = vmul.f32 0.6931472, %v1785_v41  ;;  %v1332_v40 = vsel %vm743_vm12, %v1321_v27, 0.0 }
 0x5dc   : > { %v1275_v15 = vadd.f32 %v1274_v45, %v1273_v13  ;;  %v1323_v29 = vadd.f32 %v1314_v26, %v1291_v21  ;;  %v1331_v37 = vadd.f32 %v1330_v24, %v1329_v31  ;;  %v1334_v35 = vsel %vm743_vm12, %v1322_v9, 0.0 }
 0x5dd   : > { %v1324_v33 = vadd.f32 %v1316_v59, %v1292_v28 }
 0x5de   : > { %1276 = vadd.xlane.f32.xlu0 %v1275_v15  ;;  %v1333_v36 = vadd.f32 %v1332_v40, %v1331_v37  ;;  %v1336_v48 = vsel %vm743_vm12, %v1323_v29, 0.0 }
 0x5df   : > { %v1338_v63 = vsel %vm743_vm12, %v1324_v33, 0.0 }
 0x5e0   : > { %v1335_v12 = vadd.f32 %v1334_v35, %v1333_v36 }
 0x5e2   : > { %v1337_v32 = vadd.f32 %v1336_v48, %v1335_v12 }
 0x5e4   : > { %v1339_v25 = vadd.f32 %v1338_v63, %v1337_v32 }
 0x5e6   : > { %1340 = vadd.xlane.f32.xlu0 %v1339_v25 }
 0x651   : > { %v1277_v55 = vpop.xlane.xlu0 %1276 }
 0x652   : > { %v1278_v43 = vrot.slane %v1277_v55, 4 }
 0x654   : > { %v1279_v50 = vadd.f32 %v1278_v43, %v1277_v55 }
 0x656   : > { %v1280_v30 = vrot.slane %v1279_v50, 2 }
 0x658   : > { %v1281_v44 = vadd.f32 %v1280_v30, %v1279_v50 }
 0x659   : > { %v1341_v46 = vpop.xlane.xlu0 %1340 }
 0x65a   : > { %v1342_v0 = vrot.slane %v1341_v46, 4  ;;  %v1282_v52 = vrot.slane %v1281_v44, 1 }
 0x65c   : > { %v1343_v51 = vadd.f32 %v1342_v0, %v1341_v46  ;;  %v1283_v56 = vadd.f32 %v1282_v52, %v1281_v44 }
 0x65e   : > { %v1344_v49 = vrot.slane %v1343_v51, 2  ;;  %1570 = vpush %v1283_v56 }
 0x660   : > { %v1345_v34 = vadd.f32 %v1344_v49, %v1343_v51 }
 0x662   : > { %v1346_v3 = vrot.slane %v1345_v34, 1 }
 0x664   : > { %v1347_v54 = vadd.f32 %v1346_v3, %v1345_v34 }
 0x666   : > { %1572 = vpush %v1347_v54 }
 0x68f   : > { %s1571_s10 = spop %1570 }
 0x697   : > { %s1573_s17 = spop %1572 }
 0x698   : > { %s1349_s11 = sadd.f32 %s1573_s17, %s1571_s10 }
 0x69a   : > { %v1351_v58 = vstv %s1349_s11 }
 0x69b   : > { %v1352_v10 = vadd.f32 %v1351_v58, %v1350_v42 }
 0x69d   : > { %1354 = vst.msk [vmem:[#allocation10] sm:$0x1] %vm1353_vm6, %v1352_v10 }
 0x69e PF: > { %p1355_p6 = scmp.eq.s32.totalorder %s1868_s20, 3 }
 0x6a0   : > { %p1356_p7 = pnand %p1355_p6, %p1217_p4 }
 0x6a2   : > { %1359 = sbr.rel (%p1356_p7) target bundleno = 1913 (0x779), region = 136 }
 0x6a7   : > { %v1362_v16 = vld [vmem:[#allocation7] sm:$0x1]  ;;  %v1363_v17 = vld [vmem:[#allocation7 + $0x1] sm:$0x1]  ;;  %v1385_v57 = vld [vmem:[#allocation9] sm:$0x1] }
 0x6a8   : > { %1786 = vlog2.f32 %v1362_v16  ;;  %v1386_v1 = vld [vmem:[#allocation9 + $0x1] sm:$0x1]  ;;  %v1360_v62 = vld [vmem:[#allocation6] sm:$0x1]  ;;  %v1361_v7 = vld [vmem:[#allocation6 + $0x1] sm:$0x1] }
 0x6a9   : > { %1788 = vlog2.f32 %v1363_v17  ;;  %vm1370_vm7 = vcmask 1040384   ;;  %v1383_v20 = vld [vmem:[#allocation8] sm:$0x1]  ;;  %v1384_v22 = vld [vmem:[#allocation8 + $0x1] sm:$0x1]  ;;  %vm1410_vm8 = vcmask 0  }
 0x6aa   : > { %1790 = vlog2.f32 %v1385_v57  ;;  %v1406_v35 = vld [vmem:[#allocation10] sm:$0x1] }
 0x6ab   : > { %1792 = vlog2.f32 %v1386_v1 }
 0x6ae   : > { %v1787_v5 = vpop.eup %1786 }
 0x6af   : > { %v1789_v4 = vpop.eup %1788  ;;  %v1365_v60 = vmul.f32 0.6931472, %v1787_v5 }
 0x6b0   : > { %v1791_v47 = vpop.eup %1790  ;;  %v1367_v18 = vmul.f32 0.6931472, %v1789_v4 }
 0x6b1   : > { %v1793_v19 = vpop.eup %1792  ;;  %v1368_v39 = vadd.f32 %v1365_v60, %v1360_v62  ;;  %v1388_v23 = vmul.f32 0.6931472, %v1791_v47 }
 0x6b2   : > { %v1369_v8 = vadd.f32 %v1367_v18, %v1361_v7  ;;  %v1390_v61 = vmul.f32 0.6931472, %v1793_v19 }
 0x6b3   : > { %v1371_v2 = vsel %vm1370_vm7, %v1368_v39, 0.0  ;;  %v1391_v38 = vadd.f32 %v1388_v23, %v1383_v20 }
 0x6b4   : > { %v1372_v53 = vsel %vm1370_vm7, %v1369_v8, 0.0  ;;  %v1392_v27 = vadd.f32 %v1390_v61, %v1384_v22 }
 0x6b5   : > { %v1373_v6 = vadd.f32 %v1372_v53, %v1371_v2  ;;  %v1393_v11 = vsel %vm1370_vm7, %v1391_v38, 0.0 }
 0x6b6   : > { %v1394_v45 = vsel %vm1370_vm7, %v1392_v27, 0.0 }
 0x6b7   : > { %1374 = vadd.xlane.f32.xlu0 %v1373_v6  ;;  %v1395_v21 = vadd.f32 %v1394_v45, %v1393_v11 }
 0x6bf   : > { %1396 = vadd.xlane.f32.xlu0 %v1395_v21 }
 0x72a   : > { %v1375_v14 = vpop.xlane.xlu0 %1374 }
 0x72b   : > { %v1376_v24 = vrot.slane %v1375_v14, 4 }
 0x72d   : > { %v1377_v41 = vadd.f32 %v1376_v24, %v1375_v14 }
 0x72f   : > { %v1378_v13 = vrot.slane %v1377_v41, 2 }
 0x731   : > { %v1379_v28 = vadd.f32 %v1378_v13, %v1377_v41 }
 0x732   : > { %v1397_v26 = vpop.xlane.xlu0 %1396 }
 0x733   : > { %v1398_v9 = vrot.slane %v1397_v26, 4  ;;  %v1380_v31 = vrot.slane %v1379_v28, 1 }
 0x735   : > { %v1399_v59 = vadd.f32 %v1398_v9, %v1397_v26  ;;  %v1381_v40 = vadd.f32 %v1380_v31, %v1379_v28 }
 0x737   : > { %v1400_v15 = vrot.slane %v1399_v59, 2  ;;  %1574 = vpush %v1381_v40 }
 0x739   : > { %v1401_v29 = vadd.f32 %v1400_v15, %v1399_v59 }
 0x73b   : > { %v1402_v37 = vrot.slane %v1401_v29, 1 }
 0x73d   : > { %v1403_v33 = vadd.f32 %v1402_v37, %v1401_v29 }
 0x73f   : > { %1576 = vpush %v1403_v33 }
 0x768   : > { %s1575_s19 = spop %1574 }
 0x770   : > { %s1577_s20 = spop %1576 }
 0x771   : > { %s1405_s12 = sadd.f32 %s1577_s20, %s1575_s19 }
 0x773   : > { %v1407_v36 = vstv %s1405_s12 }
 0x774   : > { %v1408_v48 = vadd.f32 %v1407_v36, %v1406_v35 }
 0x776   : > { %v1409_v12 = vmul.f32 0.00390625, %v1408_v48 }
 0x778   : > { %1411 = vst.msk [vmem:[#allocation14] sm:$0x1] %vm1410_vm8, %v1409_v12 }
 0x779 PF: > { %p1582_p8 = scmp.eq.s32.totalorder %s1512_s0, 7  ;;  %s1420_s15 = sshll.u32 %s2541_s4, 4  ;;  %s1421_s15 = int_to_ptr.hbm [resolvable:$true] %s1420_s15 }
 0x77a   : > { %s1887_s16 = smov [#allocation14]  }
 0x77b   : > { %s1418_s26 = sshll.u32 %s1887_s16, 4  ;;  %s1419_s26 = int_to_ptr.vmem [resolvable:$true] %s1418_s26 }
 0x77c   : > { %1579 = dma.vmem_to_hbm [thread:$0]  (%p1582_p8), %s1419_s26, 16, %s1421_s15, [#allocation15]  }
 0x77d   : > { %1851 = dma.done.wait (%p1582_p8), [#allocation15], 16  }
 0x77e   : > { %1853 = vsyncadd (%p1582_p8), [#allocation15], 4294967280 }
 0x77f PF: > { %s16_s23 = sadd.s32 1, %s1880_s23   ;;  %s2545_s17 = smov %s1860_s18 }
 0x780   : > { %p13_p9 = scmp.ge.s32.totalorder %s16_s23, 10   ;;  %s2546_s18 = smov %s1970_s29 }
 0x781   : > { %s2547_s19 = smov %s1872_s21  ;;  %s2548_s20 = smov %s1876_s22 }
 0x782   : > { %s2549_s21 = smov %s2552_s24  ;;  %s2550_s22 = smov %s2556_s25 }
 0x783   :  { %15 = sbr.rel (!%p13_p9) target bundleno = 6 (0x6), region = 183 }
 0x788   :  { %1434 = vsyncpa [#allocation15], 1 }
 0x789   :  { %1436 = vsyncpa [#allocation15 + $0x1], 1 }

</bundles_post_ra>
